<compile_context>
chip_gen: v7x
topology: tpu7x:2x2x1
jax: 0.10.0
libtpu: 0.0.40
codegen_flags: <defaults>
</compile_context>

<pallas_src>
import functools

import jax
import jax.numpy as jnp
from jax import lax
from jax.experimental import pallas as pl
from jax.experimental.pallas import tpu as pltpu


def _layer_norm(x, gamma, beta, eps=1e-5):
    mean = jnp.mean(x, axis=-1, keepdims=True)
    var = jnp.mean((x - mean) ** 2, axis=-1, keepdims=True)
    return (x - mean) * lax.rsqrt(var + eps) * gamma + beta


# ----------------------------------------------------------------------------
# Fused kernel: grid over layers ("arbitrary"); activation resident in VMEM.
# ----------------------------------------------------------------------------
def fused_transformer_kernel(
    x_hbm_ref,
    wqkv_ref, bqkv_ref, wo_ref, bo_ref, g1_ref, be1_ref,
    w1_ref, b1_ref, w2_ref, b2_ref, g2_ref, be2_ref,
    wh_ref, bh_ref,
    o_ref,
    x_scr, qkv_scr, attn_scr, dma_sem,
    *, num_heads, batch, seq,
):
    layer = pl.program_id(0)
    n_layers = pl.num_programs(0)

    # One-time DMA of the (already bf16, flattened) input into the resident
    # activation scratch.  The input never enters the per-step pipeline.
    @pl.when(layer == 0)
    def _():
        cp = pltpu.make_async_copy(x_hbm_ref, x_scr, dma_sem)
        cp.start()
        cp.wait()

    bf = jnp.bfloat16
    x_bf = x_scr[...]                                  # (B*S, D) bf16
    x = x_bf.astype(jnp.float32)
    D = x.shape[-1]
    dh = D // num_heads

    # ---- fused QKV projection (1/sqrt(dh) pre-folded into Q cols) ----------
    qkv = jnp.dot(x_bf, wqkv_ref[0], preferred_element_type=jnp.float32)
    qkv = qkv + bqkv_ref[0]                            # (B*S, 3D) f32
    qkv_scr[...] = qkv.reshape(batch, seq, 3 * D).astype(bf)

    # ---- multi-head attention: per-head outputs land in attn_scr columns,
    #      then ONE full-K matmul against Wo ---------------------------------
    def attn_body(b, carry):
        qkv_b = qkv_scr[b]                             # (S, 3D) bf16
        for h in range(num_heads):                     # heads: small static loop
            c0 = h * dh
            qh = qkv_b[:, c0:c0 + dh]
            kh = qkv_b[:, D + c0:D + c0 + dh]
            vh = qkv_b[:, 2 * D + c0:2 * D + c0 + dh]
            # Q @ K^T without an explicit transpose (contract dim 1 with 1).
            s = lax.dot_general(qh, kh, (((1,), (1,)), ((), ())),
                                preferred_element_type=jnp.float32)
            s = s - jnp.max(s, axis=-1, keepdims=True)
            p = jnp.exp(s)
            p = p * pl.reciprocal(jnp.sum(p, axis=-1, keepdims=True),
                                  approx=True)
            oh = jnp.dot(p.astype(bf), vh, preferred_element_type=jnp.float32)
            attn_scr[b, :, c0:c0 + dh] = oh.astype(bf)
        return carry

    lax.fori_loop(0, batch, attn_body, 0)

    attn = jnp.dot(attn_scr[...].reshape(batch * seq, D), wo_ref[0],
                   preferred_element_type=jnp.float32) + bo_ref[0]

    x1 = _layer_norm(x + attn, g1_ref[0], be1_ref[0])

    # ---- feed forward -------------------------------------------------------
    h1 = jnp.dot(x1.astype(bf), w1_ref[0],
                 preferred_element_type=jnp.float32) + b1_ref[0]
    h1 = jnp.maximum(h1, 0.0)
    h2 = jnp.dot(h1.astype(bf), w2_ref[0],
                 preferred_element_type=jnp.float32) + b2_ref[0]

    x2 = _layer_norm(x1 + h2, g2_ref[0], be2_ref[0])
    x_scr[...] = x2.astype(bf)

    # ---- collapsed head projection (kept f32 — tiny) on the last step ------
    @pl.when(layer == n_layers - 1)
    def _():
        o_ref[...] = jnp.dot(x2, wh_ref[...],
                             preferred_element_type=jnp.float32) + bh_ref[...]


# ----------------------------------------------------------------------------
# Wrapper: stack layer weights, pre-fold scale, collapse head, one pallas_call.
# ----------------------------------------------------------------------------
def transformer_model_forward(x, layers, head, num_heads):
    B, S, D = x.shape
    L = len(layers)
    F = layers[0]["w1"].shape[1]
    dh = D // num_heads
    scale = 1.0 / (dh ** 0.5)
    bf = jnp.bfloat16

    def stack(name):
        return jnp.stack([lp[name] for lp in layers], axis=0)

    wqkv = stack("wqkv")                     # (L, D, 3D)
    bqkv = stack("bqkv")                     # (L, 1, 3D)
    # pre-fold 1/sqrt(dh) into the Q projection (weight and bias)
    wqkv = wqkv.at[:, :, :D].multiply(scale)
    bqkv = bqkv.at[:, :, :D].multiply(scale)

    wo, bo = stack("wo"), stack("bo")
    g1, be1 = stack("g1"), stack("be1")
    w1, b1 = stack("w1"), stack("b1")
    w2, b2 = stack("w2"), stack("b2")
    g2, be2 = stack("g2"), stack("be2")

    # collapse Linear(D->16) -> Linear(16->odim) into one f32 Linear
    w_head = head["w_proj"] @ head["w_out"]                    # (D, odim) f32
    b_head = head["b_proj"] @ head["w_out"] + head["b_out"]    # (1, odim) f32
    odim = w_head.shape[1]

    wqkv_bf, wo_bf = wqkv.astype(bf), wo.astype(bf)
    w1_bf, w2_bf = w1.astype(bf), w2.astype(bf)

    # flatten batch*seq and cast to bf16 once in XLA (free leading-dim merge)
    x_flat = x.reshape(B * S, D).astype(bf)

    def wspec(shape):
        return pl.BlockSpec((1,) + shape,
                            lambda l, _n=len(shape): (l,) + (0,) * _n)

    kernel = functools.partial(
        fused_transformer_kernel, num_heads=num_heads, batch=B, seq=S)

    # VMEM budget: 2x (double-buffered) streamed per-layer weights + resident
    # head weights/output + scratches, with headroom.
    def nb(a):
        return int(a.size) * a.dtype.itemsize
    streamed = [wqkv_bf, bqkv, wo_bf, bo, g1, be1,
                w1_bf, b1, w2_bf, b2, g2, be2]
    per_layer = sum(nb(a) // L for a in streamed)
    scratch_bytes = (B * S * D * 2) + (B * S * 3 * D * 2) + (B * S * D * 2)
    resident = nb(w_head) + nb(b_head) + 2 * (B * S * odim * 4)
    vmem_limit = int(1.5 * (2 * per_layer + resident + scratch_bytes)) + (4 << 20)
    vmem_limit = max(16 << 20, min(vmem_limit, 100 << 20))

    out = pl.pallas_call(
        kernel,
        out_shape=jax.ShapeDtypeStruct((B * S, odim), jnp.float32),
        grid=(L,),
        in_specs=[
            pl.BlockSpec(memory_space=pl.ANY),                 # x, DMA'd once
            wspec((D, 3 * D)), wspec((1, 3 * D)),              # qkv
            wspec((D, D)), wspec((1, D)),                      # out proj
            wspec((1, D)), wspec((1, D)),                      # ln1
            wspec((D, F)), wspec((1, F)),                      # ffn 1
            wspec((F, D)), wspec((1, D)),                      # ffn 2
            wspec((1, D)), wspec((1, D)),                      # ln2
            pl.BlockSpec((D, odim), lambda l: (0, 0)),         # collapsed head W
            pl.BlockSpec((1, odim), lambda l: (0, 0)),         # collapsed head b
        ],
        out_specs=pl.BlockSpec((B * S, odim), lambda l: (0, 0)),
        scratch_shapes=[
            pltpu.VMEM((B * S, D), bf),        # resident activation
            pltpu.VMEM((B, S, 3 * D), bf),     # QKV
            pltpu.VMEM((B, S, D), bf),         # per-head attention outputs
            pltpu.SemaphoreType.DMA(()),       # input DMA semaphore
        ],
        compiler_params=pltpu.CompilerParams(
            dimension_semantics=("arbitrary",),
            vmem_limit_bytes=vmem_limit),
    )(
        x_flat,
        wqkv_bf, bqkv, wo_bf, bo,
        g1, be1,
        w1_bf, b1, w2_bf, b2,
        g2, be2,
        w_head, b_head,
    )
    return out.reshape(B, S, odim)


# ----------------------------------------------------------------------------
# Parameter construction.
# ----------------------------------------------------------------------------
def init_params(key, n_layers, model_dim, forward_dim, output_dim):
    layers = []
    for _ in range(n_layers):
        keys = jax.random.split(key, 5)
        key = keys[0]
        D, F = model_dim, forward_dim
        layers.append(dict(
            wqkv=0.02 * jax.random.normal(keys[1], (D, 3 * D), jnp.float32),
            bqkv=jnp.zeros((1, 3 * D), jnp.float32),
            wo=0.02 * jax.random.normal(keys[2], (D, D), jnp.float32),
            bo=jnp.zeros((1, D), jnp.float32),
            g1=jnp.ones((1, D), jnp.float32), be1=jnp.zeros((1, D), jnp.float32),
            w1=0.02 * jax.random.normal(keys[3], (D, F), jnp.float32),
            b1=jnp.zeros((1, F), jnp.float32),
            w2=0.02 * jax.random.normal(keys[4], (F, D), jnp.float32),
            b2=jnp.zeros((1, D), jnp.float32),
            g2=jnp.ones((1, D), jnp.float32), be2=jnp.zeros((1, D), jnp.float32),
        ))
    k1, k2 = jax.random.split(key)
    head = dict(
        w_proj=0.02 * jax.random.normal(k1, (model_dim, 16), jnp.float32),
        b_proj=jnp.zeros((1, 16), jnp.float32),
        w_out=0.02 * jax.random.normal(k2, (16, output_dim), jnp.float32),
        b_out=jnp.zeros((1, output_dim), jnp.float32),
    )
    return layers, head


if __name__ == "__main__":
    # small, forward-consistent shapes (seq multiple of 16 keeps bf16 scratch
    # row slices tile-aligned)
    n_layers, num_heads, model_dim, forward_dim, output_dim = 2, 4, 64, 128, 4
    batch, seq = 2, 16

    key = jax.random.PRNGKey(0)
    kx, kp = jax.random.split(key)
    x = jax.random.normal(kx, (batch, seq, model_dim), jnp.float32)

    layers, head = init_params(kp, n_layers, model_dim, forward_dim, output_dim)

    out = transformer_model_forward(x, layers, head, num_heads)
    out = jax.block_until_ready(out)
    assert out.shape == (batch, seq, output_dim)
    print("KERNEL_OK")
</pallas_src>

<mosaic_0001>
module attributes {stable_mosaic.version = 11 : i64} {
  func.func @fused_transformer_kernel(%arg0: i32, %arg1: memref<32x64xbf16, #tpu.memory_space<any>>, %arg2: memref<1x64x192xbf16, #tpu.memory_space<vmem>>, %arg3: memref<1x1x192xf32, #tpu.memory_space<vmem>>, %arg4: memref<1x64x64xbf16, #tpu.memory_space<vmem>>, %arg5: memref<1x1x64xf32, #tpu.memory_space<vmem>>, %arg6: memref<1x1x64xf32, #tpu.memory_space<vmem>>, %arg7: memref<1x1x64xf32, #tpu.memory_space<vmem>>, %arg8: memref<1x64x128xbf16, #tpu.memory_space<vmem>>, %arg9: memref<1x1x128xf32, #tpu.memory_space<vmem>>, %arg10: memref<1x128x64xbf16, #tpu.memory_space<vmem>>, %arg11: memref<1x1x64xf32, #tpu.memory_space<vmem>>, %arg12: memref<1x1x64xf32, #tpu.memory_space<vmem>>, %arg13: memref<1x1x64xf32, #tpu.memory_space<vmem>>, %arg14: memref<64x4xf32, #tpu.memory_space<vmem>>, %arg15: memref<1x4xf32, #tpu.memory_space<vmem>>, %arg16: memref<32x4xf32, #tpu.memory_space<vmem>>, %arg17: memref<32x64xbf16, #tpu.memory_space<vmem>>, %arg18: memref<2x16x192xbf16, #tpu.memory_space<vmem>>, %arg19: memref<2x16x64xbf16, #tpu.memory_space<vmem>>, %arg20: memref<!tpu.dma_semaphore, #tpu.memory_space<semaphore_mem>>) attributes {dimension_semantics = [#tpu.dimension_semantics<arbitrary>], iteration_bounds = array<i64: 2>, scalar_prefetch = 0 : i64, scratch_operands = 4 : i64, tpu.core_type = #tpu.core_type<tc>, window_params = [{}, {transform_indices = @transform_1, window_bounds = array<i64: 1, 64, 192>}, {transform_indices = @transform_2, window_bounds = array<i64: 1, 1, 192>}, {transform_indices = @transform_3, window_bounds = array<i64: 1, 64, 64>}, {transform_indices = @transform_4, window_bounds = array<i64: 1, 1, 64>}, {transform_indices = @transform_5, window_bounds = array<i64: 1, 1, 64>}, {transform_indices = @transform_6, window_bounds = array<i64: 1, 1, 64>}, {transform_indices = @transform_7, window_bounds = array<i64: 1, 64, 128>}, {transform_indices = @transform_8, window_bounds = array<i64: 1, 1, 128>}, {transform_indices = @transform_9, window_bounds = array<i64: 1, 128, 64>}, {transform_indices = @transform_10, window_bounds = array<i64: 1, 1, 64>}, {transform_indices = @transform_11, window_bounds = array<i64: 1, 1, 64>}, {transform_indices = @transform_12, window_bounds = array<i64: 1, 1, 64>}, {pipeline_mode = #tpu.pipeline_mode<synchronous>, transform_indices = @transform_13, window_bounds = array<i64: 64, 4>}, {pipeline_mode = #tpu.pipeline_mode<synchronous>, transform_indices = @transform_14, window_bounds = array<i64: 1, 4>}, {pipeline_mode = #tpu.pipeline_mode<synchronous>, transform_indices = @transform_15, window_bounds = array<i64: 32, 4>}]} {
    %c0_i32 = arith.constant 0 : i32
    %0 = arith.cmpi eq, %arg0, %c0_i32 : i32
    %1 = arith.extui %0 : i1 to i32
    %c0_i32_0 = arith.constant 0 : i32
    %2 = arith.cmpi ne, %1, %c0_i32_0 : i32
    scf.if %2 {
      tpu.enqueue_dma source(%arg1 : memref<32x64xbf16, #tpu.memory_space<any>>) target(%arg17 : memref<32x64xbf16, #tpu.memory_space<vmem>>) target_semaphore(%arg20 : memref<!tpu.dma_semaphore, #tpu.memory_space<semaphore_mem>>)
      tpu.wait_dma2 semaphore(%arg20 : memref<!tpu.dma_semaphore, #tpu.memory_space<semaphore_mem>>) src(%arg1 : memref<32x64xbf16, #tpu.memory_space<any>>) dst(%arg17 : memref<32x64xbf16, #tpu.memory_space<vmem>>)
    } else {
    }
    %c0 = arith.constant 0 : index
    %c0_1 = arith.constant 0 : index
    %3 = vector.load %arg17[%c0, %c0_1] : memref<32x64xbf16, #tpu.memory_space<vmem>>, vector<32x64xbf16>
    %4 = arith.extf %3 : vector<32x64xbf16> to vector<32x64xf32>
    %c0_2 = arith.constant 0 : index
    %c0_3 = arith.constant 0 : index
    %c0_4 = arith.constant 0 : index
    %5 = vector.load %arg2[%c0_2, %c0_3, %c0_4] : memref<1x64x192xbf16, #tpu.memory_space<vmem>>, vector<1x64x192xbf16>
    %6 = vector.shape_cast %5 : vector<1x64x192xbf16> to vector<64x192xbf16>
    %cst = arith.constant dense<0.000000e+00> : vector<32x192xf32>
    %7 = tpu.matmul %3, %6, %cst {dimension_numbers = #tpu.dot_dimension_numbers<[1], [0], [0], [1], [0, 0, 1, 1], [], []>} : vector<32x64xbf16>, vector<64x192xbf16>, vector<32x192xf32> -> vector<32x192xf32>
    %c0_5 = arith.constant 0 : index
    %c0_6 = arith.constant 0 : index
    %c0_7 = arith.constant 0 : index
    %8 = vector.load %arg3[%c0_5, %c0_6, %c0_7] : memref<1x1x192xf32, #tpu.memory_space<vmem>>, vector<1x1x192xf32>
    %9 = vector.shape_cast %8 : vector<1x1x192xf32> to vector<1x192xf32>
    %10 = vector.broadcast %9 : vector<1x192xf32> to vector<32x192xf32>
    %11 = arith.addf %7, %10 : vector<32x192xf32>
    %12 = vector.shape_cast %11 : vector<32x192xf32> to vector<2x16x192xf32>
    %13 = arith.truncf %12 : vector<2x16x192xf32> to vector<2x16x192xbf16>
    %c0_8 = arith.constant 0 : index
    %c0_9 = arith.constant 0 : index
    %c0_10 = arith.constant 0 : index
    %14 = vector.load %arg18[%c0_8, %c0_9, %c0_10] : memref<2x16x192xbf16, #tpu.memory_space<vmem>>, vector<2x16x192xbf16>
    tpu.vector_store %arg18[%c0_8, %c0_9, %c0_10], %13 {strides = array<i32>} : memref<2x16x192xbf16, #tpu.memory_space<vmem>>, vector<2x16x192xbf16>,
    %c0_i32_11 = arith.constant 0 : i32
    %c2_i32 = arith.constant 2 : i32
    %15 = arith.addi %c0_i32_11, %c2_i32 : i32
    %c1_i32 = arith.constant 1 : i32
    scf.for %arg21 = %c0_i32_11 to %15 step %c1_i32  : i32 {
      %102 = arith.index_cast %arg21 : i32 to index
      %c0_64 = arith.constant 0 : index
      %c0_65 = arith.constant 0 : index
      %103 = vector.load %arg18[%102, %c0_64, %c0_65] : memref<2x16x192xbf16, #tpu.memory_space<vmem>>, vector<1x16x192xbf16>
      %104 = vector.shape_cast %103 : vector<1x16x192xbf16> to vector<16x192xbf16>
      %105 = vector.extract_strided_slice %104 {offsets = [0, 0], sizes = [16, 16], strides = [1, 1]} : vector<16x192xbf16> to vector<16x16xbf16>
      %106 = vector.extract_strided_slice %104 {offsets = [0, 64], sizes = [16, 16], strides = [1, 1]} : vector<16x192xbf16> to vector<16x16xbf16>
      %107 = vector.extract_strided_slice %104 {offsets = [0, 128], sizes = [16, 16], strides = [1, 1]} : vector<16x192xbf16> to vector<16x16xbf16>
      %cst_66 = arith.constant dense<0.000000e+00> : vector<16x16xf32>
      %108 = tpu.matmul %105, %106, %cst_66 {dimension_numbers = #tpu.dot_dimension_numbers<[1], [1], [0], [0], [0, 0, 1, 0], [], []>} : vector<16x16xbf16>, vector<16x16xbf16>, vector<16x16xf32> -> vector<16x16xf32>
      %cst_67 = arith.constant dense<0xFF800000> : vector<16xf32>
      %109 = vector.multi_reduction <maximumf>, %108, %cst_67 [1] : vector<16x16xf32> to vector<16xf32>
      %110 = vector.shape_cast %109 : vector<16xf32> to vector<16x1xf32>
      %111 = vector.broadcast %110 : vector<16x1xf32> to vector<16x16xf32>
      %112 = arith.subf %108, %111 : vector<16x16xf32>
      %113 = math.exp %112 : vector<16x16xf32>
      %cst_68 = arith.constant dense<0.000000e+00> : vector<16xf32>
      %114 = vector.multi_reduction <add>, %113, %cst_68 [1] : vector<16x16xf32> to vector<16xf32>
      %115 = vector.shape_cast %114 : vector<16xf32> to vector<16x1xf32>
      %116 = tpu.reciprocal %115 {approx = true} : vector<16x1xf32> -> vector<16x1xf32>
      %117 = vector.broadcast %116 : vector<16x1xf32> to vector<16x16xf32>
      %118 = arith.mulf %113, %117 : vector<16x16xf32>
      %119 = arith.truncf %118 : vector<16x16xf32> to vector<16x16xbf16>
      %cst_69 = arith.constant dense<0.000000e+00> : vector<16x16xf32>
      %120 = tpu.matmul %119, %107, %cst_69 {dimension_numbers = #tpu.dot_dimension_numbers<[1], [0], [0], [1], [0, 0, 1, 1], [], []>} : vector<16x16xbf16>, vector<16x16xbf16>, vector<16x16xf32> -> vector<16x16xf32>
      %121 = arith.truncf %120 : vector<16x16xf32> to vector<16x16xbf16>
      %122 = arith.index_cast %arg21 : i32 to index
      %c0_70 = arith.constant 0 : index
      %c0_71 = arith.constant 0 : index
      %123 = vector.load %arg19[%122, %c0_70, %c0_71] : memref<2x16x64xbf16, #tpu.memory_space<vmem>>, vector<1x16x16xbf16>
      %124 = vector.shape_cast %123 : vector<1x16x16xbf16> to vector<16x16xbf16>
      %125 = vector.shape_cast %121 : vector<16x16xbf16> to vector<1x16x16xbf16>
      tpu.vector_store %arg19[%122, %c0_70, %c0_71], %125 {strides = array<i32>} : memref<2x16x64xbf16, #tpu.memory_space<vmem>>, vector<1x16x16xbf16>,
      %126 = vector.extract_strided_slice %104 {offsets = [0, 16], sizes = [16, 16], strides = [1, 1]} : vector<16x192xbf16> to vector<16x16xbf16>
      %127 = vector.extract_strided_slice %104 {offsets = [0, 80], sizes = [16, 16], strides = [1, 1]} : vector<16x192xbf16> to vector<16x16xbf16>
      %128 = vector.extract_strided_slice %104 {offsets = [0, 144], sizes = [16, 16], strides = [1, 1]} : vector<16x192xbf16> to vector<16x16xbf16>
      %cst_72 = arith.constant dense<0.000000e+00> : vector<16x16xf32>
      %129 = tpu.matmul %126, %127, %cst_72 {dimension_numbers = #tpu.dot_dimension_numbers<[1], [1], [0], [0], [0, 0, 1, 0], [], []>} : vector<16x16xbf16>, vector<16x16xbf16>, vector<16x16xf32> -> vector<16x16xf32>
      %cst_73 = arith.constant dense<0xFF800000> : vector<16xf32>
      %130 = vector.multi_reduction <maximumf>, %129, %cst_73 [1] : vector<16x16xf32> to vector<16xf32>
      %131 = vector.shape_cast %130 : vector<16xf32> to vector<16x1xf32>
      %132 = vector.broadcast %131 : vector<16x1xf32> to vector<16x16xf32>
      %133 = arith.subf %129, %132 : vector<16x16xf32>
      %134 = math.exp %133 : vector<16x16xf32>
      %cst_74 = arith.constant dense<0.000000e+00> : vector<16xf32>
      %135 = vector.multi_reduction <add>, %134, %cst_74 [1] : vector<16x16xf32> to vector<16xf32>
      %136 = vector.shape_cast %135 : vector<16xf32> to vector<16x1xf32>
      %137 = tpu.reciprocal %136 {approx = true} : vector<16x1xf32> -> vector<16x1xf32>
      %138 = vector.broadcast %137 : vector<16x1xf32> to vector<16x16xf32>
      %139 = arith.mulf %134, %138 : vector<16x16xf32>
      %140 = arith.truncf %139 : vector<16x16xf32> to vector<16x16xbf16>
      %cst_75 = arith.constant dense<0.000000e+00> : vector<16x16xf32>
      %141 = tpu.matmul %140, %128, %cst_75 {dimension_numbers = #tpu.dot_dimension_numbers<[1], [0], [0], [1], [0, 0, 1, 1], [], []>} : vector<16x16xbf16>, vector<16x16xbf16>, vector<16x16xf32> -> vector<16x16xf32>
      %142 = arith.truncf %141 : vector<16x16xf32> to vector<16x16xbf16>
      %143 = arith.index_cast %arg21 : i32 to index
      %c0_76 = arith.constant 0 : index
      %c16 = arith.constant 16 : index
      %144 = vector.load %arg19[%143, %c0_76, %c16] : memref<2x16x64xbf16, #tpu.memory_space<vmem>>, vector<1x16x16xbf16>
      %145 = vector.shape_cast %144 : vector<1x16x16xbf16> to vector<16x16xbf16>
      %146 = vector.shape_cast %142 : vector<16x16xbf16> to vector<1x16x16xbf16>
      tpu.vector_store %arg19[%143, %c0_76, %c16], %146 {strides = array<i32>} : memref<2x16x64xbf16, #tpu.memory_space<vmem>>, vector<1x16x16xbf16>,
      %147 = vector.extract_strided_slice %104 {offsets = [0, 32], sizes = [16, 16], strides = [1, 1]} : vector<16x192xbf16> to vector<16x16xbf16>
      %148 = vector.extract_strided_slice %104 {offsets = [0, 96], sizes = [16, 16], strides = [1, 1]} : vector<16x192xbf16> to vector<16x16xbf16>
      %149 = vector.extract_strided_slice %104 {offsets = [0, 160], sizes = [16, 16], strides = [1, 1]} : vector<16x192xbf16> to vector<16x16xbf16>
      %cst_77 = arith.constant dense<0.000000e+00> : vector<16x16xf32>
      %150 = tpu.matmul %147, %148, %cst_77 {dimension_numbers = #tpu.dot_dimension_numbers<[1], [1], [0], [0], [0, 0, 1, 0], [], []>} : vector<16x16xbf16>, vector<16x16xbf16>, vector<16x16xf32> -> vector<16x16xf32>
      %cst_78 = arith.constant dense<0xFF800000> : vector<16xf32>
      %151 = vector.multi_reduction <maximumf>, %150, %cst_78 [1] : vector<16x16xf32> to vector<16xf32>
      %152 = vector.shape_cast %151 : vector<16xf32> to vector<16x1xf32>
      %153 = vector.broadcast %152 : vector<16x1xf32> to vector<16x16xf32>
      %154 = arith.subf %150, %153 : vector<16x16xf32>
      %155 = math.exp %154 : vector<16x16xf32>
      %cst_79 = arith.constant dense<0.000000e+00> : vector<16xf32>
      %156 = vector.multi_reduction <add>, %155, %cst_79 [1] : vector<16x16xf32> to vector<16xf32>
      %157 = vector.shape_cast %156 : vector<16xf32> to vector<16x1xf32>
      %158 = tpu.reciprocal %157 {approx = true} : vector<16x1xf32> -> vector<16x1xf32>
      %159 = vector.broadcast %158 : vector<16x1xf32> to vector<16x16xf32>
      %160 = arith.mulf %155, %159 : vector<16x16xf32>
      %161 = arith.truncf %160 : vector<16x16xf32> to vector<16x16xbf16>
      %cst_80 = arith.constant dense<0.000000e+00> : vector<16x16xf32>
      %162 = tpu.matmul %161, %149, %cst_80 {dimension_numbers = #tpu.dot_dimension_numbers<[1], [0], [0], [1], [0, 0, 1, 1], [], []>} : vector<16x16xbf16>, vector<16x16xbf16>, vector<16x16xf32> -> vector<16x16xf32>
      %163 = arith.truncf %162 : vector<16x16xf32> to vector<16x16xbf16>
      %164 = arith.index_cast %arg21 : i32 to index
      %c0_81 = arith.constant 0 : index
      %c32 = arith.constant 32 : index
      %165 = vector.load %arg19[%164, %c0_81, %c32] : memref<2x16x64xbf16, #tpu.memory_space<vmem>>, vector<1x16x16xbf16>
      %166 = vector.shape_cast %165 : vector<1x16x16xbf16> to vector<16x16xbf16>
      %167 = vector.shape_cast %163 : vector<16x16xbf16> to vector<1x16x16xbf16>
      tpu.vector_store %arg19[%164, %c0_81, %c32], %167 {strides = array<i32>} : memref<2x16x64xbf16, #tpu.memory_space<vmem>>, vector<1x16x16xbf16>,
      %168 = vector.extract_strided_slice %104 {offsets = [0, 48], sizes = [16, 16], strides = [1, 1]} : vector<16x192xbf16> to vector<16x16xbf16>
      %169 = vector.extract_strided_slice %104 {offsets = [0, 112], sizes = [16, 16], strides = [1, 1]} : vector<16x192xbf16> to vector<16x16xbf16>
      %170 = vector.extract_strided_slice %104 {offsets = [0, 176], sizes = [16, 16], strides = [1, 1]} : vector<16x192xbf16> to vector<16x16xbf16>
      %cst_82 = arith.constant dense<0.000000e+00> : vector<16x16xf32>
      %171 = tpu.matmul %168, %169, %cst_82 {dimension_numbers = #tpu.dot_dimension_numbers<[1], [1], [0], [0], [0, 0, 1, 0], [], []>} : vector<16x16xbf16>, vector<16x16xbf16>, vector<16x16xf32> -> vector<16x16xf32>
      %cst_83 = arith.constant dense<0xFF800000> : vector<16xf32>
      %172 = vector.multi_reduction <maximumf>, %171, %cst_83 [1] : vector<16x16xf32> to vector<16xf32>
      %173 = vector.shape_cast %172 : vector<16xf32> to vector<16x1xf32>
      %174 = vector.broadcast %173 : vector<16x1xf32> to vector<16x16xf32>
      %175 = arith.subf %171, %174 : vector<16x16xf32>
      %176 = math.exp %175 : vector<16x16xf32>
      %cst_84 = arith.constant dense<0.000000e+00> : vector<16xf32>
      %177 = vector.multi_reduction <add>, %176, %cst_84 [1] : vector<16x16xf32> to vector<16xf32>
      %178 = vector.shape_cast %177 : vector<16xf32> to vector<16x1xf32>
      %179 = tpu.reciprocal %178 {approx = true} : vector<16x1xf32> -> vector<16x1xf32>
      %180 = vector.broadcast %179 : vector<16x1xf32> to vector<16x16xf32>
      %181 = arith.mulf %176, %180 : vector<16x16xf32>
      %182 = arith.truncf %181 : vector<16x16xf32> to vector<16x16xbf16>
      %cst_85 = arith.constant dense<0.000000e+00> : vector<16x16xf32>
      %183 = tpu.matmul %182, %170, %cst_85 {dimension_numbers = #tpu.dot_dimension_numbers<[1], [0], [0], [1], [0, 0, 1, 1], [], []>} : vector<16x16xbf16>, vector<16x16xbf16>, vector<16x16xf32> -> vector<16x16xf32>
      %184 = arith.truncf %183 : vector<16x16xf32> to vector<16x16xbf16>
      %185 = arith.index_cast %arg21 : i32 to index
      %c0_86 = arith.constant 0 : index
      %c48 = arith.constant 48 : index
      %186 = vector.load %arg19[%185, %c0_86, %c48] : memref<2x16x64xbf16, #tpu.memory_space<vmem>>, vector<1x16x16xbf16>
      %187 = vector.shape_cast %186 : vector<1x16x16xbf16> to vector<16x16xbf16>
      %188 = vector.shape_cast %184 : vector<16x16xbf16> to vector<1x16x16xbf16>
      tpu.vector_store %arg19[%185, %c0_86, %c48], %188 {strides = array<i32>} : memref<2x16x64xbf16, #tpu.memory_space<vmem>>, vector<1x16x16xbf16>,
    }
    %c2_i32_12 = arith.constant 2 : i32
    %c0_13 = arith.constant 0 : index
    %c0_14 = arith.constant 0 : index
    %c0_15 = arith.constant 0 : index
    %16 = vector.load %arg19[%c0_13, %c0_14, %c0_15] : memref<2x16x64xbf16, #tpu.memory_space<vmem>>, vector<2x16x64xbf16>
    %17 = vector.shape_cast %16 : vector<2x16x64xbf16> to vector<32x64xbf16>
    %c0_16 = arith.constant 0 : index
    %c0_17 = arith.constant 0 : index
    %c0_18 = arith.constant 0 : index
    %18 = vector.load %arg4[%c0_16, %c0_17, %c0_18] : memref<1x64x64xbf16, #tpu.memory_space<vmem>>, vector<1x64x64xbf16>
    %19 = vector.shape_cast %18 : vector<1x64x64xbf16> to vector<64x64xbf16>
    %cst_19 = arith.constant dense<0.000000e+00> : vector<32x64xf32>
    %20 = tpu.matmul %17, %19, %cst_19 {dimension_numbers = #tpu.dot_dimension_numbers<[1], [0], [0], [1], [0, 0, 1, 1], [], []>} : vector<32x64xbf16>, vector<64x64xbf16>, vector<32x64xf32> -> vector<32x64xf32>
    %c0_20 = arith.constant 0 : index
    %c0_21 = arith.constant 0 : index
    %c0_22 = arith.constant 0 : index
    %21 = vector.load %arg5[%c0_20, %c0_21, %c0_22] : memref<1x1x64xf32, #tpu.memory_space<vmem>>, vector<1x1x64xf32>
    %22 = vector.shape_cast %21 : vector<1x1x64xf32> to vector<1x64xf32>
    %23 = vector.broadcast %22 : vector<1x64xf32> to vector<32x64xf32>
    %24 = arith.addf %20, %23 : vector<32x64xf32>
    %25 = arith.addf %4, %24 : vector<32x64xf32>
    %c0_23 = arith.constant 0 : index
    %c0_24 = arith.constant 0 : index
    %c0_25 = arith.constant 0 : index
    %26 = vector.load %arg6[%c0_23, %c0_24, %c0_25] : memref<1x1x64xf32, #tpu.memory_space<vmem>>, vector<1x1x64xf32>
    %27 = vector.shape_cast %26 : vector<1x1x64xf32> to vector<1x64xf32>
    %c0_26 = arith.constant 0 : index
    %c0_27 = arith.constant 0 : index
    %c0_28 = arith.constant 0 : index
    %28 = vector.load %arg7[%c0_26, %c0_27, %c0_28] : memref<1x1x64xf32, #tpu.memory_space<vmem>>, vector<1x1x64xf32>
    %29 = vector.shape_cast %28 : vector<1x1x64xf32> to vector<1x64xf32>
    %cst_29 = arith.constant dense<0.000000e+00> : vector<32xf32>
    %30 = vector.multi_reduction <add>, %25, %cst_29 [1] : vector<32x64xf32> to vector<32xf32>
    %31 = vector.shape_cast %30 : vector<32xf32> to vector<32x1xf32>
    %cst_30 = arith.constant 6.400000e+01 : f32
    %32 = vector.broadcast %cst_30 : f32 to vector<32x1xf32>
    %33 = arith.divf %31, %32 : vector<32x1xf32>
    %34 = vector.broadcast %33 : vector<32x1xf32> to vector<32x64xf32>
    %35 = arith.subf %25, %34 : vector<32x64xf32>
    %36 = arith.mulf %35, %35 : vector<32x64xf32>
    %cst_31 = arith.constant dense<0.000000e+00> : vector<32xf32>
    %37 = vector.multi_reduction <add>, %36, %cst_31 [1] : vector<32x64xf32> to vector<32xf32>
    %38 = vector.shape_cast %37 : vector<32xf32> to vector<32x1xf32>
    %cst_32 = arith.constant 6.400000e+01 : f32
    %39 = vector.broadcast %cst_32 : f32 to vector<32x1xf32>
    %40 = arith.divf %38, %39 : vector<32x1xf32>
    %41 = vector.broadcast %33 : vector<32x1xf32> to vector<32x64xf32>
    %42 = arith.subf %25, %41 : vector<32x64xf32>
    %cst_33 = arith.constant 9.99999974E-6 : f32
    %43 = vector.broadcast %cst_33 : f32 to vector<32x1xf32>
    %44 = arith.addf %40, %43 : vector<32x1xf32>
    %45 = math.rsqrt %44 : vector<32x1xf32>
    %46 = vector.broadcast %45 : vector<32x1xf32> to vector<32x64xf32>
    %47 = arith.mulf %42, %46 : vector<32x64xf32>
    %48 = vector.broadcast %27 : vector<1x64xf32> to vector<32x64xf32>
    %49 = arith.mulf %47, %48 : vector<32x64xf32>
    %50 = vector.broadcast %29 : vector<1x64xf32> to vector<32x64xf32>
    %51 = arith.addf %49, %50 : vector<32x64xf32>
    %52 = arith.truncf %51 : vector<32x64xf32> to vector<32x64xbf16>
    %c0_34 = arith.constant 0 : index
    %c0_35 = arith.constant 0 : index
    %c0_36 = arith.constant 0 : index
    %53 = vector.load %arg8[%c0_34, %c0_35, %c0_36] : memref<1x64x128xbf16, #tpu.memory_space<vmem>>, vector<1x64x128xbf16>
    %54 = vector.shape_cast %53 : vector<1x64x128xbf16> to vector<64x128xbf16>
    %cst_37 = arith.constant dense<0.000000e+00> : vector<32x128xf32>
    %55 = tpu.matmul %52, %54, %cst_37 {dimension_numbers = #tpu.dot_dimension_numbers<[1], [0], [0], [1], [0, 0, 1, 1], [], []>} : vector<32x64xbf16>, vector<64x128xbf16>, vector<32x128xf32> -> vector<32x128xf32>
    %c0_38 = arith.constant 0 : index
    %c0_39 = arith.constant 0 : index
    %c0_40 = arith.constant 0 : index
    %56 = vector.load %arg9[%c0_38, %c0_39, %c0_40] : memref<1x1x128xf32, #tpu.memory_space<vmem>>, vector<1x1x128xf32>
    %57 = vector.shape_cast %56 : vector<1x1x128xf32> to vector<1x128xf32>
    %58 = vector.broadcast %57 : vector<1x128xf32> to vector<32x128xf32>
    %59 = arith.addf %55, %58 : vector<32x128xf32>
    %cst_41 = arith.constant 0.000000e+00 : f32
    %60 = vector.broadcast %cst_41 : f32 to vector<32x128xf32>
    %61 = arith.maximumf %59, %60 : vector<32x128xf32>
    %62 = arith.truncf %61 : vector<32x128xf32> to vector<32x128xbf16>
    %c0_42 = arith.constant 0 : index
    %c0_43 = arith.constant 0 : index
    %c0_44 = arith.constant 0 : index
    %63 = vector.load %arg10[%c0_42, %c0_43, %c0_44] : memref<1x128x64xbf16, #tpu.memory_space<vmem>>, vector<1x128x64xbf16>
    %64 = vector.shape_cast %63 : vector<1x128x64xbf16> to vector<128x64xbf16>
    %cst_45 = arith.constant dense<0.000000e+00> : vector<32x64xf32>
    %65 = tpu.matmul %62, %64, %cst_45 {dimension_numbers = #tpu.dot_dimension_numbers<[1], [0], [0], [1], [0, 0, 1, 1], [], []>} : vector<32x128xbf16>, vector<128x64xbf16>, vector<32x64xf32> -> vector<32x64xf32>
    %c0_46 = arith.constant 0 : index
    %c0_47 = arith.constant 0 : index
    %c0_48 = arith.constant 0 : index
    %66 = vector.load %arg11[%c0_46, %c0_47, %c0_48] : memref<1x1x64xf32, #tpu.memory_space<vmem>>, vector<1x1x64xf32>
    %67 = vector.shape_cast %66 : vector<1x1x64xf32> to vector<1x64xf32>
    %68 = vector.broadcast %67 : vector<1x64xf32> to vector<32x64xf32>
    %69 = arith.addf %65, %68 : vector<32x64xf32>
    %70 = arith.addf %51, %69 : vector<32x64xf32>
    %c0_49 = arith.constant 0 : index
    %c0_50 = arith.constant 0 : index
    %c0_51 = arith.constant 0 : index
    %71 = vector.load %arg12[%c0_49, %c0_50, %c0_51] : memref<1x1x64xf32, #tpu.memory_space<vmem>>, vector<1x1x64xf32>
    %72 = vector.shape_cast %71 : vector<1x1x64xf32> to vector<1x64xf32>
    %c0_52 = arith.constant 0 : index
    %c0_53 = arith.constant 0 : index
    %c0_54 = arith.constant 0 : index
    %73 = vector.load %arg13[%c0_52, %c0_53, %c0_54] : memref<1x1x64xf32, #tpu.memory_space<vmem>>, vector<1x1x64xf32>
    %74 = vector.shape_cast %73 : vector<1x1x64xf32> to vector<1x64xf32>
    %cst_55 = arith.constant dense<0.000000e+00> : vector<32xf32>
    %75 = vector.multi_reduction <add>, %70, %cst_55 [1] : vector<32x64xf32> to vector<32xf32>
    %76 = vector.shape_cast %75 : vector<32xf32> to vector<32x1xf32>
    %cst_56 = arith.constant 6.400000e+01 : f32
    %77 = vector.broadcast %cst_56 : f32 to vector<32x1xf32>
    %78 = arith.divf %76, %77 : vector<32x1xf32>
    %79 = vector.broadcast %78 : vector<32x1xf32> to vector<32x64xf32>
    %80 = arith.subf %70, %79 : vector<32x64xf32>
    %81 = arith.mulf %80, %80 : vector<32x64xf32>
    %cst_57 = arith.constant dense<0.000000e+00> : vector<32xf32>
    %82 = vector.multi_reduction <add>, %81, %cst_57 [1] : vector<32x64xf32> to vector<32xf32>
    %83 = vector.shape_cast %82 : vector<32xf32> to vector<32x1xf32>
    %cst_58 = arith.constant 6.400000e+01 : f32
    %84 = vector.broadcast %cst_58 : f32 to vector<32x1xf32>
    %85 = arith.divf %83, %84 : vector<32x1xf32>
    %86 = vector.broadcast %78 : vector<32x1xf32> to vector<32x64xf32>
    %87 = arith.subf %70, %86 : vector<32x64xf32>
    %cst_59 = arith.constant 9.99999974E-6 : f32
    %88 = vector.broadcast %cst_59 : f32 to vector<32x1xf32>
    %89 = arith.addf %85, %88 : vector<32x1xf32>
    %90 = math.rsqrt %89 : vector<32x1xf32>
    %91 = vector.broadcast %90 : vector<32x1xf32> to vector<32x64xf32>
    %92 = arith.mulf %87, %91 : vector<32x64xf32>
    %93 = vector.broadcast %72 : vector<1x64xf32> to vector<32x64xf32>
    %94 = arith.mulf %92, %93 : vector<32x64xf32>
    %95 = vector.broadcast %74 : vector<1x64xf32> to vector<32x64xf32>
    %96 = arith.addf %94, %95 : vector<32x64xf32>
    %97 = arith.truncf %96 : vector<32x64xf32> to vector<32x64xbf16>
    %c0_60 = arith.constant 0 : index
    %c0_61 = arith.constant 0 : index
    %98 = vector.load %arg17[%c0_60, %c0_61] : memref<32x64xbf16, #tpu.memory_space<vmem>>, vector<32x64xbf16>
    tpu.vector_store %arg17[%c0_60, %c0_61], %97 {strides = array<i32>} : memref<32x64xbf16, #tpu.memory_space<vmem>>, vector<32x64xbf16>,
    %c1_i32_62 = arith.constant 1 : i32
    %99 = arith.cmpi eq, %arg0, %c1_i32_62 : i32
    %100 = arith.extui %99 : i1 to i32
    %c0_i32_63 = arith.constant 0 : i32
    %101 = arith.cmpi ne, %100, %c0_i32_63 : i32
    scf.if %101 {
      %c0_64 = arith.constant 0 : index
      %c0_65 = arith.constant 0 : index
      %102 = vector.load %arg14[%c0_64, %c0_65] : memref<64x4xf32, #tpu.memory_space<vmem>>, vector<64x4xf32>
      %cst_66 = arith.constant dense<0.000000e+00> : vector<32x4xf32>
      %103 = tpu.matmul %96, %102, %cst_66 {dimension_numbers = #tpu.dot_dimension_numbers<[1], [0], [0], [1], [0, 0, 1, 1], [], []>} : vector<32x64xf32>, vector<64x4xf32>, vector<32x4xf32> -> vector<32x4xf32>
      %c0_67 = arith.constant 0 : index
      %c0_68 = arith.constant 0 : index
      %104 = vector.load %arg15[%c0_67, %c0_68] : memref<1x4xf32, #tpu.memory_space<vmem>>, vector<1x4xf32>
      %105 = vector.broadcast %104 : vector<1x4xf32> to vector<32x4xf32>
      %106 = arith.addf %103, %105 : vector<32x4xf32>
      %c0_69 = arith.constant 0 : index
      %c0_70 = arith.constant 0 : index
      %107 = vector.load %arg16[%c0_69, %c0_70] : memref<32x4xf32, #tpu.memory_space<vmem>>, vector<32x4xf32>
      tpu.vector_store %arg16[%c0_69, %c0_70], %106 {strides = array<i32>} : memref<32x4xf32, #tpu.memory_space<vmem>>, vector<32x4xf32>,
    } else {
    }
    return
  }
  func.func @transform_1(%arg0: i32) -> (i32, i32, i32) {
    %c0_i32 = arith.constant 0 : i32
    %c0_i32_0 = arith.constant 0 : i32
    %c0_i32_1 = arith.constant 0 : i32
    return %arg0, %c0_i32, %c0_i32_0 : i32, i32, i32
  }
  func.func @transform_2(%arg0: i32) -> (i32, i32, i32) {
    %c0_i32 = arith.constant 0 : i32
    %c0_i32_0 = arith.constant 0 : i32
    %c0_i32_1 = arith.constant 0 : i32
    return %arg0, %c0_i32, %c0_i32_0 : i32, i32, i32
  }
  func.func @transform_3(%arg0: i32) -> (i32, i32, i32) {
    %c0_i32 = arith.constant 0 : i32
    %c0_i32_0 = arith.constant 0 : i32
    %c0_i32_1 = arith.constant 0 : i32
    return %arg0, %c0_i32, %c0_i32_0 : i32, i32, i32
  }
  func.func @transform_4(%arg0: i32) -> (i32, i32, i32) {
    %c0_i32 = arith.constant 0 : i32
    %c0_i32_0 = arith.constant 0 : i32
    %c0_i32_1 = arith.constant 0 : i32
    return %arg0, %c0_i32, %c0_i32_0 : i32, i32, i32
  }
  func.func @transform_5(%arg0: i32) -> (i32, i32, i32) {
    %c0_i32 = arith.constant 0 : i32
    %c0_i32_0 = arith.constant 0 : i32
    %c0_i32_1 = arith.constant 0 : i32
    return %arg0, %c0_i32, %c0_i32_0 : i32, i32, i32
  }
  func.func @transform_6(%arg0: i32) -> (i32, i32, i32) {
    %c0_i32 = arith.constant 0 : i32
    %c0_i32_0 = arith.constant 0 : i32
    %c0_i32_1 = arith.constant 0 : i32
    return %arg0, %c0_i32, %c0_i32_0 : i32, i32, i32
  }
  func.func @transform_7(%arg0: i32) -> (i32, i32, i32) {
    %c0_i32 = arith.constant 0 : i32
    %c0_i32_0 = arith.constant 0 : i32
    %c0_i32_1 = arith.constant 0 : i32
    return %arg0, %c0_i32, %c0_i32_0 : i32, i32, i32
  }
  func.func @transform_8(%arg0: i32) -> (i32, i32, i32) {
    %c0_i32 = arith.constant 0 : i32
    %c0_i32_0 = arith.constant 0 : i32
    %c0_i32_1 = arith.constant 0 : i32
    return %arg0, %c0_i32, %c0_i32_0 : i32, i32, i32
  }
  func.func @transform_9(%arg0: i32) -> (i32, i32, i32) {
    %c0_i32 = arith.constant 0 : i32
    %c0_i32_0 = arith.constant 0 : i32
    %c0_i32_1 = arith.constant 0 : i32
    return %arg0, %c0_i32, %c0_i32_0 : i32, i32, i32
  }
  func.func @transform_10(%arg0: i32) -> (i32, i32, i32) {
    %c0_i32 = arith.constant 0 : i32
    %c0_i32_0 = arith.constant 0 : i32
    %c0_i32_1 = arith.constant 0 : i32
    return %arg0, %c0_i32, %c0_i32_0 : i32, i32, i32
  }
  func.func @transform_11(%arg0: i32) -> (i32, i32, i32) {
    %c0_i32 = arith.constant 0 : i32
    %c0_i32_0 = arith.constant 0 : i32
    %c0_i32_1 = arith.constant 0 : i32
    return %arg0, %c0_i32, %c0_i32_0 : i32, i32, i32
  }
  func.func @transform_12(%arg0: i32) -> (i32, i32, i32) {
    %c0_i32 = arith.constant 0 : i32
    %c0_i32_0 = arith.constant 0 : i32
    %c0_i32_1 = arith.constant 0 : i32
    return %arg0, %c0_i32, %c0_i32_0 : i32, i32, i32
  }
  func.func @transform_13(%arg0: i32) -> (i32, i32) {
    %c0_i32 = arith.constant 0 : i32
    %c0_i32_0 = arith.constant 0 : i32
    %c0_i32_1 = arith.constant 0 : i32
    return %c0_i32, %c0_i32_0 : i32, i32
  }
  func.func @transform_14(%arg0: i32) -> (i32, i32) {
    %c0_i32 = arith.constant 0 : i32
    %c0_i32_0 = arith.constant 0 : i32
    %c0_i32_1 = arith.constant 0 : i32
    return %c0_i32, %c0_i32_0 : i32, i32
  }
  func.func @transform_15(%arg0: i32) -> (i32, i32) {
    %c0_i32 = arith.constant 0 : i32
    %c0_i32_0 = arith.constant 0 : i32
    %c0_i32_1 = arith.constant 0 : i32
    return %c0_i32, %c0_i32_0 : i32, i32
  }
}

</mosaic_0001>

<bundles_post_ra>
// kernel: tpu_custom_call.1
= control target key start
LH: loop header
LB: loop body
LE: loop exit
PB: predicated region body
PF: predicated region fallthrough
CT: control target
= control target key end

     0   :  { %s3131_s0 = inlined_call_operand.vmem [shape: bf16[32,64], index: 0, kind: input, shape index: {}]   ;;  %s3132_s1 = inlined_call_operand.vmem [shape: bf16[2,64,192], index: 1, kind: input, shape index: {}]   ;;  %s3133_s2 = inlined_call_operand.vmem [shape: f32[2,1,192], index: 2, kind: input, shape index: {}]   ;;  %s3134_s3 = inlined_call_operand.vmem [shape: bf16[2,64,64], index: 3, kind: input, shape index: {}]   ;;  %s3135_s4 = inlined_call_operand.vmem [shape: f32[2,1,64], index: 4, kind: input, shape index: {}]   ;;  %s3136_s5 = inlined_call_operand.vmem [shape: f32[2,1,64], index: 5, kind: input, shape index: {}]   ;;  %s3137_s6 = inlined_call_operand.vmem [shape: f32[2,1,64], index: 6, kind: input, shape index: {}]   ;;  %s3138_s7 = inlined_call_operand.hbm [shape: bf16[2,64,128], index: 7, kind: input, shape index: {}]   ;;  %s3139_s8 = inlined_call_operand.vmem [shape: f32[2,1,128], index: 8, kind: input, shape index: {}]   ;;  %s3140_s9 = inlined_call_operand.vmem [shape: bf16[2,128,64], index: 9, kind: input, shape index: {}]   ;;  %s3141_s10 = inlined_call_operand.vmem [shape: f32[2,1,64], index: 10, kind: input, shape index: {}]   ;;  %s3142_s11 = inlined_call_operand.vmem [shape: f32[2,1,64], index: 11, kind: input, shape index: {}]   ;;  %s3143_s12 = inlined_call_operand.vmem [shape: f32[2,1,64], index: 12, kind: input, shape index: {}]   ;;  %s3144_s13 = inlined_call_operand.vmem [shape: f32[64,4], index: 13, kind: input, shape index: {}]   ;;  %s3145_s14 = inlined_call_operand.vmem [shape: f32[1,4], index: 14, kind: input, shape index: {}]   ;;  %s3146_s15 = inlined_call_operand.vmem [shape: f32[32,4], index: 15, kind: output, shape index: {}]  }
   0x1   :  { %3154 = sst [smem:[#allocation17_spill]] %s3132_s1 }
   0x2   :  { %3155 = sst [smem:[#allocation18_spill]] %s3133_s2 }
   0x3   :  { %3156 = sst [smem:[#allocation19_spill]] %s3138_s7 }
   0x4   :  { %3157 = sst [smem:[#allocation20_spill]] %s3144_s13 }
   0x5   :  { %3158 = sst [smem:[#allocation21_spill]] %s3145_s14 }
   0x6   :  { %3159 = sst [smem:[#allocation22_spill]] %s3146_s15 }
   0x7   :  { %20 = vsyncpa [#allocation7], 0 }
   0x8   :  { %22 = vsyncpa [#allocation7 + $0x1], 0  ;;  %s2705_s18 = smov 0   ;;  %s2707_s19 = smov 0  }
   0x9   :  { %s2709_s20 = smov 0   ;;  %s2711_s21 = smov 0  }
   0xa LB: > { %3160 = sst [smem:[#allocation11_spill]] %s2598_s19  ;;  %s2724_s22 = sadd.s32 4294967295, %s2606_s21   ;;  %s2606_s21 = sphi %s2711_s21, %s3179_s21   ;;  %s2602_s20 = sphi %s2709_s20, %s3182_s20   ;;  %s2598_s19 = sphi %s2707_s19, %s3181_s19   ;;  %s2594_s18 = sphi %s2705_s18, %s3180_s18  }
   0xb   : > { %3161 = sst [smem:[#allocation12_spill]] %s2602_s20  ;;  %s2727_s23 = sadd.s32 1, %s2606_s21  }
   0xc   : > { %3162 = sst [smem:[#allocation13_spill]] %s2727_s23  ;;  %s188_s24 = ssub.s32 %s2606_s21, %s2727_s23 }
   0xd   : > { %s191_s25 = sadd.s32 1, %s2602_s20  ;;  %p189_p0 = scmp.eq.s32.totalorder %s188_s24, 0 }
   0xe   : > { %p198_p1 = scmp.ne.s32.totalorder %s2602_s20, %s2598_s19  ;;  %p199_p2 = scmp.eq.s32.totalorder %s2606_s21, 0 }
   0xf   : > { %p204_p3 = scmp.ne.s32.totalorder %s2598_s19, %s2594_s18  ;;  %p205_p5 = scmp.eq.s32.totalorder %s2724_s22, 0 }
  0x10   : > { %s2737_s26 = scalar_select %p189_p0, %s2602_s20, %s191_s25  }
  0x11   : > { %p200_p4 = por %p199_p2, %p198_p1  ;;  %p2407_p6 = scmp.lt.s32.totalorder %s2606_s21, 2 }
  0x12   : > { %3163 = sst [smem:[#allocation14_spill]] %s2737_s26  ;;  %p2741_p7 = por %p205_p5, %p204_p3 }
  0x13   : > { %s468_s28 = sand.u32 1, %s2602_s20   ;;  %s2200_s30 = sshll.u32 %s2606_s21, 9 }
  0x14   : > { %s2130_s29 = sshll.u32 %s468_s28, 5  ;;  %s3165_s7 = sld [smem:[#allocation19_spill]] }
  0x15   : > { %s472_s18 = scalar_lea.vmem [#allocation6], %s2130_s29  ;;  %p2754_p8 = pnand %p2407_p6, %p200_p4 }
  0x16   : > { %s479_s25 = sshll.u32 %s472_s18, 4  ;;  %s2759_s20 = scalar_lea.sflag [#allocation7], %s468_s28  ;;  %s2752_s25 = int_to_ptr.vmem [resolvable:$true] %s479_s25 }
  0x17   : > { %p2538_p11 = pneg %p2754_p8 }
  0x1a   : > { %s2750_s24 = scalar_lea.hbm %s3165_s7, %s2200_s30  ;;  %s2541_s17 = scalar_lea.hbm %s3165_s7, 1024 }
  0x1b   : > { %s2536_s16 = scalar_lea.hbm %s2750_s24, 512  ;;  %p2542_p0 = scmp.lt.u32.totalorder %s2750_s24, %s3165_s7 }
  0x1c   : > { %p2537_p10 = scmp.ne.s32.totalorder %s2750_s24, %s2536_s16  ;;  %p2543_p1 = scmp.lt.u32.totalorder %s2541_s17, %s2536_s16 }
  0x1d   : > { %p2545_p3 = scmp.lt.u32.totalorder %s2536_s16, %s2750_s24 }
  0x1e   : > { %p2539_p12 = pnand %p2538_p11, %p2537_p10  ;;  %p2544_p2 = por %p2543_p1, %p2542_p0 }
  0x20   : > { %p2540_p13 = pneg %p2539_p12  ;;  %p2546_p4 = por %p2545_p3, %p2544_p2 }
  0x22   : > { %p2547_p5 = pnand %p2546_p4, %p2540_p13 }
  0x24   : > { %2550 = shalt.err (!%p2547_p5)
}
  0x25   : > { %s2551_s28 = scalar_lea.vmem %s2752_s25, 512  ;;  %s2612_s29 = smov [#allocation6]  }
  0x26   : > { %p2552_p6 = scmp.ne.s32.totalorder %s2752_s25, %s2551_s28  ;;  %s2556_s30 = sshll.u32 %s2612_s29, 4  ;;  %s2557_s30 = int_to_ptr.vmem [resolvable:$false] %s2556_s30 }
  0x27   : > { %s2558_s23 = scalar_lea.vmem %s2557_s30, 1024  ;;  %p2559_p9 = scmp.lt.s32.totalorder %s2752_s25, %s2557_s30 }
  0x28   : > { %p2554_p10 = pnand %p2552_p6, %p2538_p11  ;;  %p2560_p0 = scmp.lt.s32.totalorder %s2558_s23, %s2551_s28 }
  0x2a   : > { %p2555_p12 = pneg %p2554_p10  ;;  %p2561_p1 = por %p2560_p0, %p2559_p9 }
  0x2c   : > { %p2562_p2 = pnand %p2561_p1, %p2555_p12 }
  0x2e   : > { %2565 = shalt.err (!%p2562_p2)
}
  0x2f   : > { %s2613_s16 = smov 64   ;;  %s2614_s17 = smov 4  }
  0x30   : > { %2406 = dma.hbm_to_vmem [thread:$0]  (!%p2754_p8), %s2750_s24, 512, %s2752_s25, %s2759_s20, %s2613_s16, %s2613_s16, %s2614_s17  }
  0x31   : > { %p519_p11 = scmp.lt.s32.totalorder %s2606_s21, 3  ;;  %p3167_p13 = scmp.ge.s32.totalorder %s2606_s21, 1 }
  0x33   : > { %p520_p3 = pnand %p3167_p13, %p519_p11 }
  0x35   : > { %523 = sbr.rel (%p520_p3) target bundleno = 3440 (0xd70), region = 76 }
  0x3c   : > { %s525_s18 = sand.u32 1, %s2598_s19  }
  0x3d   : > { %s2134_s28 = sshll.u32 %s525_s18, 5  ;;  %s526_s29 = scalar_lea.sflag [#allocation7], %s525_s18 }
  0x3e   : > { %s2791_s30 = scalar_lea.vmem [#allocation6], %s2134_s28 }
  0x3f   : > { %3168 = sst [smem:[#allocation15_spill]] %s2791_s30 }
  0x40   : > { %2587 = dma.done.wait (%p2741_p7), %s526_s29, 512  }
  0x41   : > { %2589 = vsyncadd (%p2741_p7), %s526_s29, 4294966784  ;;  %p609_p9 = scmp.lt.s32.totalorder %s2724_s22, 1  ;;  %s3169_s1 = sld [smem:[#allocation17_spill]] }
  0x42   : > { %s3170_s2 = sld [smem:[#allocation18_spill]]  ;;  %p2142_p7 = scmp.ne.s32.totalorder %s2724_s22, 0 }
  0x43   : > { %s2799_s20 = scalar_select %p609_p9, %s2724_s22, 1 }
  0x44   : > { %v686_v0 = vld [vmem:[%s3131_s0] sm:$0xff] (!%p2142_p7)  ;;  %v688_v1 = vld [vmem:[%s3131_s0 + $0x8] sm:$0xff] (!%p2142_p7) }
  0x45   : > { %s2201_s21 = sshll.u32 %s2799_s20, 6  ;;  %s2137_s26 = sshll.u32 %s2799_s20, 1  ;;  %687 = vst [vmem:[#allocation2] sm:$0xff] (!%p2142_p7), %v686_v0  ;;  %689 = vst [vmem:[#allocation2 + $0x8] sm:$0xff] (!%p2142_p7), %v688_v1 }
  0x46   : > { %s2202_s18 = sshll.u32 %s2799_s20, 5  ;;  %s631_s23 = scalar_lea.vmem %s3137_s6, %s2799_s20 }
  0x47   : > { %s2806_s25 = scalar_lea.vmem %s3169_s1, %s2201_s21  ;;  %s2821_s14 = scalar_lea.vmem %s3134_s3, %s2202_s18 }
  0x48   : > { %s2811_s17 = scalar_lea.vmem %s3170_s2, %s2137_s26  ;;  %s634_s2 = scalar_lea.vmem %s3139_s8, %s2799_s20 }
  0x49   : > { %3171 = sst [smem:[#allocation16_spill]] %s2811_s17  ;;  %s2838_s29 = scalar_lea.vmem %s3140_s9, %s2201_s21 }
  0x4a   : > { %s642_s18 = scalar_lea.vmem %s3141_s10, %s2799_s20  ;;  %s645_s30 = scalar_lea.vmem %s3142_s11, %s2799_s20 }
  0x4b   : > { %s648_s27 = scalar_lea.vmem %s3143_s12, %s2799_s20  ;;  %653 = sbr.rel (%p2142_p7) target bundleno = 85 (0x55), region = 84 }
  0x52   : > { %697 = vsyncadd [#allocation5], 256 }
  0x53   : > { %2590 = dma.done.wait [#allocation5], 256 }
  0x54   : > { %2591 = vsyncadd [#allocation5], 4294967040 }
  0x55 PF: > { %v2460_v2 = vld [vmem:[%s2806_s25 + $0x4] ss:$8 sps:$4 sm:$0xff]   ;;  %v2462_v3 = vld [vmem:[%s2806_s25] ss:$8 sps:$4 sm:$0xff]   ;;  %v2615_v4 = vmov 0   ;;  %s3172_s7 = sld [smem:[#allocation16_spill]]  ;;  %v718_v17 = vlaneseq }
  0x56   : > { %807 = vmatprep.mubr.bf16.mxu0 %v2615_v4  ;;  %817 = vmatprep.mubr.bf16.mxu1 %v2615_v4  ;;  %v2463_v5 = vld [vmem:[%s2806_s25 + $0x14] ss:$8 sps:$4 sm:$0xff]   ;;  %v2465_v6 = vld [vmem:[%s2806_s25 + $0x10] ss:$8 sps:$4 sm:$0xff]   ;;  %v2466_v7 = vld [vmem:[%s2806_s25 + $0x24] ss:$8 sps:$4 sm:$0xff]  }
  0x57   : > { %775 = vmatprep.subr.bf16.mxu0 %v2460_v2  ;;  %2385 = vmatprep.subr.bf16.mxu1 %v2460_v2  ;;  %v2864_v8 = vld [vmem:[#allocation2] sm:$0xff]  ;;  %v2866_v9 = vld [vmem:[#allocation2 + $0x8] sm:$0xff]  ;;  %v2469_v15 = vld [vmem:[%s2806_s25 + $0x34] ss:$8 sps:$4 sm:$0xff]   ;;  %vm768_vm0 = vcmask 523264   ;;  %v719_v18 = vshrl.u32 %v718_v17, 7 }
  0x58   : > { %776 = vmatpush1.bf16.msra.mxu0 %v2462_v3  ;;  %2389 = vmatpush1.bf16.msra.mxu1 %v2462_v3  ;;  %v704_v10 = vunpack.c.l.bf16 %v2864_v8  ;;  %v705_v11 = vunpack.c.h.bf16 %v2864_v8  ;;  %v706_v12 = vunpack.c.l.bf16 %v2866_v9  ;;  %v707_v13 = vunpack.c.h.bf16 %v2866_v9  ;;  %v2468_v14 = vld [vmem:[%s2806_s25 + $0x20] ss:$8 sps:$4 sm:$0xff]   ;;  %v2471_v16 = vld [vmem:[%s2806_s25 + $0x30] ss:$8 sps:$4 sm:$0xff]   ;;  %s2882_s25 = smov 0  }
  0x59   : > { %777 = vmatprep.subr.bf16.mxu0 %v2463_v5  ;;  %2386 = vmatprep.subr.bf16.mxu1 %v2463_v5  ;;  %v720_v19 = vsub.s32 0, %v719_v18  ;;  %v724_v21 = vsub.s32 1, %v719_v18 }
  0x5b   : > { %v716_v20 = vld [vmem:[%s3172_s7] sm:$0x3] }
  0x5c   : > { %778 = vmatpush1.bf16.msra.mxu0 %v2465_v6  ;;  %2390 = vmatpush1.bf16.msra.mxu1 %v2465_v6  ;;  %v721_v22 = vrot.slane %v716_v20, %v720_v19  ;;  %v725_v25 = vrot.slane %v716_v20, %v724_v21 }
  0x5d   : > { %779 = vmatprep.subr.bf16.mxu0 %v2466_v7  ;;  %2387 = vmatprep.subr.bf16.mxu1 %v2466_v7 }
  0x60   : > { %780 = vmatpush1.bf16.msra.mxu0 %v2468_v14  ;;  %2391 = vmatpush1.bf16.msra.mxu1 %v2468_v14 }
  0x61   : > { %781 = vmatprep.subr.bf16.mxu0 %v2469_v15  ;;  %2388 = vmatprep.subr.bf16.mxu1 %v2469_v15 }
  0x64   : > { %782 = vmatpush1.bf16.msra.mxu0 %v2471_v16  ;;  %2392 = vmatpush1.bf16.msra.mxu1 %v2471_v16 }
  0x67   : > { %2151 = vmatmul.mubr.msk.bf16.vlgmr.msra.gmra.mrb[0].mxu0 %vm768_vm0, %v2864_v8  ;;  %2152 = vmatmul.mubr.msk.bf16.vlgmr.msra.gmra.mrb[0].mxu1 %vm768_vm0, %v2866_v9 }
 0x13a   : > { %v809_v23 = vpop.f32.mrb[0].mxu0  ;;  %v819_v24 = vpop.f32.mrb[0].mxu1 }
 0x13b   : > { %v811_v26 = vpop.f32.mrb[1].mxu0  ;;  %v821_v27 = vpop.f32.mrb[1].mxu1  ;;  %v810_v30 = vadd.f32 %v809_v23, %v721_v22  ;;  %v820_v31 = vadd.f32 %v819_v24, %v721_v22 }
 0x13c   : > { %v813_v28 = vpop.f32.mrb[2].mxu0  ;;  %v823_v29 = vpop.f32.mrb[2].mxu1  ;;  %v812_v36 = vadd.f32 %v811_v26, %v725_v25  ;;  %v822_v37 = vadd.f32 %v821_v27, %v725_v25 }
 0x13d   : > { %v814_v32 = vadd.f32 %v813_v28, %v721_v22  ;;  %v824_v33 = vadd.f32 %v823_v29, %v721_v22  ;;  %v815_v34 = vpop.f32.mrb[3].mxu0  ;;  %v825_v35 = vpop.f32.mrb[3].mxu1 }
 0x13e   : > { %v816_v38 = vadd.f32 %v815_v34, %v725_v25  ;;  %v826_v39 = vadd.f32 %v825_v35, %v725_v25 }
 0x13f   : > { %v828_v40 = vpack.c.bf16 %v814_v32, %v810_v30  ;;  %v830_v41 = vpack.c.bf16 %v824_v33, %v820_v31 }
 0x140   : > { %v829_v42 = vpack.c.bf16 %v816_v38, %v812_v36  ;;  %v831_v43 = vpack.c.bf16 %v826_v39, %v822_v37 }
 0x141   : > { %832 = vst [vmem:[#allocation3] sm:$0xff] %v828_v40  ;;  %834 = vst [vmem:[#allocation3 + $0x10] sm:$0xff] %v830_v41 }
 0x142   : > { %833 = vst.msk [vmem:[#allocation3 + $0x8] sm:$0xff] %vm768_vm0, %v829_v42  ;;  %835 = vst.msk [vmem:[#allocation3 + $0x18] sm:$0xff] %vm768_vm0, %v831_v43 }
 0x143 LB: >> { %v2616_v44 = vmov 0.0   ;;  %vm2617_vm1 = vmmov 0   ;;  %s2204_s24 = sshll.u32 %s2610_s25, 4  ;;  %s2618_s15 = smov 64   ;;  %vm850_vm2 = vcmask 130048   ;;  %vm1096_vm3 = vcmask 261248   ;;  %s2610_s25 = sphi %s2882_s25, %s841_s25  }
 0x144   : >> { %2255 = vmatprep.subr.bf16.mxu0 %v2616_v44  ;;  %2257 = vmatprep.mubr.msk.bf16.mxu0 %vm2617_vm1, %v2616_v44  ;;  %s2894_s28 = scalar_lea.vmem [#allocation3], %s2204_s24  ;;  %s2619_s19 = smov 48   ;;  %vm1224_vm4 = vcmask 392448   ;;  %vm1352_vm5 = vcmask 523648  }
 0x145   : >> { %2261 = vmatprep.subr.bf16.mxu1 %v2616_v44  ;;  %2263 = vmatprep.mubr.msk.bf16.mxu1 %vm2617_vm1, %v2616_v44  ;;  %s2620_s13 = smov 96   ;;  %s2621_s1 = smov 112  }
 0x146   : >> { %s2622_s26 = smov 32   ;;  %s2623_s16 = smov 16  }
 0x147   : >> { %s2624_s21 = smov 80   ;;  %s2157_s17 = sshll.u32 %s2610_s25, 3 }
 0x148   : >> { %s2933_s7 = scalar_lea.vmem [#allocation4], %s2157_s17  ;;  %s841_s25 = sadd.s32 1, %s2610_s25  }
 0x149   : >> { %v845_v45 = vld [vmem:[%s2894_s28] sm:$0xff]  ;;  %v2909_v0 = vld [vmem:[%s2894_s28 + $0x8] sm:$0xff]  ;;  %p838_p8 = scmp.ge.s32.totalorder %s841_s25, 2  }
 0x14a   : >> { %848 = vrot.lane.b32.xlu0 %v845_v45, %s2618_s15  ;;  %2262 = vmatpush3.bf16.msra.mxu1 %v2909_v0  ;;  %s3173_s28 = scalar_lea.vmem (%p838_p8), %s3135_s4, %s2799_s20  ;;  %p2191_p4 = scmp.ne.s32.totalorder (%p838_p8), %s2724_s22, 1 }
 0x14b   : >> { %2267 = vmatprep.subr.bf16.mxu1 %v2616_v44 }
 0x1bc   : >> { %v849_v46 = vpop.permute.xlu0 %848 }
 0x1bd   : >> { %v855_v47 = vsel %vm850_vm2, %v849_v46, 0 }
 0x1be   : >> { %2256 = vmatpush3.bf16.xpose.msra.mxu0 %v855_v47 }
 0x1bf   : >> { %2273 = vmatprep.subr.bf16.mxu0 %v2616_v44 }
 0x1c5   : >> { %2258 = vmatmul.mubr.msk.bf16.vlgmr.msra.gmra.mrb[0].mxu0 %vm850_vm2, %v845_v45 }
 0x1c6   : >> { %2275 = vmatprep.mubr.msk.bf16.mxu0 %vm2617_vm1, %v2616_v44 }
 0x298   : >> { %v891_v48 = vpop.f32.mrb[0].mxu0 }
 0x299   : >> { %v2259_v49 = vpop.f32.mrb[1].mxu0  ;;  %v898_v50 = vsel %vm850_vm2, %v891_v48, -inf }
 0x29a   : >> { %899 = vmax.xlane.f32.xlu0 %v898_v50  ;;  %v894_v51 = vpop.f32.mrb[2].mxu0 }
 0x29b   : >> { %v2260_v52 = vpop.f32.mrb[3].mxu0  ;;  %v901_v53 = vsel %vm850_vm2, %v894_v51, -inf }
 0x29c   : >> { %902 = vmax.xlane.f32.xlu1 %v901_v53 }
 0x2ad   : >> { %971 = vrot.lane.b32.xlu1 %v845_v45, %s2619_s19 }
 0x2b0   : >> { %1098 = vrot.lane.b32.xlu0 %v845_v45, %s2620_s13 }
 0x327   : >> { %v900_v54 = vpop.xlane.xlu0 %899 }
 0x328   : >> { %v904_v55 = vsub.f32 %v891_v48, %v900_v54 }
 0x329   : >> { %v903_v56 = vpop.xlane.xlu1 %902 }
 0x32a   : >> { %v906_v57 = vmul.f32 1.442695, %v904_v55  ;;  %v905_v58 = vsub.f32 %v894_v51, %v903_v56 }
 0x32b   : >> { %v1099_v20 = vpop.permute.xlu0 %1098 }
 0x32c   : >> { %2472 = vpow2.f32 %v906_v57  ;;  %v908_v59 = vmul.f32 1.442695, %v905_v58 }
 0x32d   : >> { %v972_v1 = vpop.permute.xlu1 %971 }
 0x32e   : >> { %2474 = vpow2.f32 %v908_v59  ;;  %v977_v16 = vsel %vm850_vm2, %v972_v1, 0 }
 0x336   : >> { %v2473_v60 = vpop.eup %2472 }
 0x337   : >> { %v910_v61 = vsel %vm850_vm2, %v2473_v60, 0.0 }
 0x338   : >> { %v2475_v62 = vpop.eup %2474  ;;  %911 = vadd.xlane.f32.xlu1 %v910_v61 }
 0x339   : >> { %v913_v63 = vsel %vm850_vm2, %v2475_v62, 0.0 }
 0x33c   : >> { %914 = vadd.xlane.f32.xlu1 %v913_v63 }
 0x34d   : >> { %969 = vrot.lane.b32.xlu1 %v845_v45, %s2621_s1 }
 0x351   : >> { %1100 = vrot.lane.b32.xlu1 %v845_v45, %s2622_s26 }
 0x355   : >> { %1228 = vrot.lane.b32.xlu1 %v845_v45, %s2623_s16 }
 0x359   : >> { %1226 = vrot.lane.b32.xlu1 %v845_v45, %s2624_s21 }
 0x3c5   : >> { %v912_v2 = vpop.xlane.xlu1 %911 }
 0x3c6   : >> { %2476 = vrcp.f32 %v912_v2 }
 0x3c9   : >> { %v915_v3 = vpop.xlane.xlu1 %914 }
 0x3ca   : >> { %2478 = vrcp.f32 %v915_v3 }
 0x3cd   : >> { %v970_v14 = vpop.permute.xlu1 %969 }
 0x3d0   : >> { %v2477_v4 = vpop.eup %2476 }
 0x3d1   : >> { %v918_v6 = vmul.f32 %v2477_v4, %v2473_v60  ;;  %v1101_v17 = vpop.permute.xlu1 %1100 }
 0x3d2   : >> { %v1106_v18 = vsel %vm850_vm2, %v1101_v17, 0 }
 0x3d4   : >> { %v2479_v5 = vpop.eup %2478 }
 0x3d5   : >> { %v919_v7 = vmul.f32 %v2479_v5, %v2475_v62  ;;  %v1229_v19 = vpop.permute.xlu1 %1228 }
 0x3d6   : >> { %v1234_v21 = vsel %vm850_vm2, %v1229_v19, 0 }
 0x3d7   : >> { %v920_v15 = vpack.c.bf16 %v919_v7, %v918_v6 }
 0x3d9   : >> { %2264 = vmatmul.mubr.msk.bf16.vlgmr.msra.gmra.mrb[0].mxu1 %vm850_vm2, %v920_v15  ;;  %v1227_v22 = vpop.permute.xlu1 %1226 }
 0x3da   : >> { %2268 = vmatpush3.bf16.xpose.msra.mxu1 %v977_v16  ;;  %2269 = vmatprep.mubr.msk.bf16.mxu1 %vm2617_vm1, %v2616_v44 }
 0x3db   : >> { %2279 = vmatprep.subr.bf16.mxu1 %v2616_v44 }
 0x3e1   : >> { %2270 = vmatmul.mubr.msk.bf16.vlgmr.msra.gmra.mrb[4].mxu1 %vm850_vm2, %v970_v14 }
 0x3e2   : >> { %2280 = vmatpush3.bf16.xpose.msra.mxu1 %v1106_v18  ;;  %2281 = vmatprep.mubr.msk.bf16.mxu1 %vm2617_vm1, %v2616_v44 }
 0x3e3   : >> { %2291 = vmatprep.subr.bf16.mxu1 %v2616_v44 }
 0x3e9   : >> { %2282 = vmatmul.mubr.msk.bf16.vlgmr.msra.gmra.mrb[8].mxu1 %vm850_vm2, %v1099_v20 }
 0x3ea   : >> { %2292 = vmatpush3.bf16.xpose.msra.mxu1 %v1234_v21  ;;  %2293 = vmatprep.mubr.msk.bf16.mxu1 %vm2617_vm1, %v2616_v44 }
 0x3f1   : >> { %2294 = vmatmul.mubr.msk.bf16.vlgmr.msra.gmra.mrb[12].mxu1 %vm850_vm2, %v1227_v22 }
 0x4ac   : >> { %v958_v23 = vpop.f32.mrb[0].mxu1 }
 0x4ad   : >> { %v2265_v24 = vpop.f32.mrb[1].mxu1 }
 0x4ae   : >> { %v961_v25 = vpop.f32.mrb[2].mxu1 }
 0x4af   : >> { %v965_v26 = vpack.c.bf16 %v961_v25, %v958_v23  ;;  %v2266_v27 = vpop.f32.mrb[3].mxu1 }
 0x4b1   : >> { %968 = vst.msk [vmem:[%s2933_s7] sm:$0xff] %vm850_vm2, %v965_v26 }
 0x4b4   : >> { %v1013_v28 = vpop.f32.mrb[4].mxu1 }
 0x4b5   : >> { %v2271_v29 = vpop.f32.mrb[5].mxu1  ;;  %v1020_v30 = vsel %vm850_vm2, %v1013_v28, -inf }
 0x4b6   : >> { %1021 = vmax.xlane.f32.xlu1 %v1020_v30  ;;  %v1016_v31 = vpop.f32.mrb[6].mxu1 }
 0x4b7   : >> { %v2272_v32 = vpop.f32.mrb[7].mxu1  ;;  %v1023_v33 = vsel %vm850_vm2, %v1016_v31, -inf }
 0x4b8   : >> { %1024 = vmax.xlane.f32.xlu0 %v1023_v33 }
 0x4bc   : >> { %v1142_v34 = vpop.f32.mrb[8].mxu1 }
 0x4bd   : >> { %v2283_v35 = vpop.f32.mrb[9].mxu1  ;;  %v1149_v36 = vsel %vm850_vm2, %v1142_v34, -inf }
 0x4be   : >> { %1150 = vmax.xlane.f32.xlu1 %v1149_v36  ;;  %v1145_v37 = vpop.f32.mrb[10].mxu1 }
 0x4bf   : >> { %v2284_v38 = vpop.f32.mrb[11].mxu1  ;;  %v1152_v39 = vsel %vm850_vm2, %v1145_v37, -inf }
 0x4c2   : >> { %1153 = vmax.xlane.f32.xlu1 %v1152_v39 }
 0x4c4   : >> { %v1270_v40 = vpop.f32.mrb[12].mxu1 }
 0x4c5   : >> { %v2295_v41 = vpop.f32.mrb[13].mxu1  ;;  %v1277_v42 = vsel %vm850_vm2, %v1270_v40, -inf }
 0x4c6   : >> { %1278 = vmax.xlane.f32.xlu0 %v1277_v42  ;;  %v1273_v43 = vpop.f32.mrb[14].mxu1 }
 0x4c7   : >> { %v1280_v45 = vsel %vm850_vm2, %v1273_v43, -inf  ;;  %v2296_v46 = vpop.f32.mrb[15].mxu1 }
 0x4c8   : >> { %1281 = vmax.xlane.f32.xlu1 %v1280_v45 }
 0x543   : >> { %v1022_v47 = vpop.xlane.xlu1 %1021 }
 0x544   : >> { %v1026_v48 = vsub.f32 %v1013_v28, %v1022_v47 }
 0x545   : >> { %v1025_v49 = vpop.xlane.xlu0 %1024 }
 0x546   : >> { %v1028_v50 = vmul.f32 1.442695, %v1026_v48  ;;  %v1027_v51 = vsub.f32 %v1016_v31, %v1025_v49 }
 0x548   : >> { %2480 = vpow2.f32 %v1028_v50  ;;  %v1030_v52 = vmul.f32 1.442695, %v1027_v51 }
 0x54a   : >> { %2482 = vpow2.f32 %v1030_v52 }
 0x54b   : >> { %v1151_v53 = vpop.xlane.xlu1 %1150 }
 0x54c   : >> { %v1155_v54 = vsub.f32 %v1142_v34, %v1151_v53 }
 0x54e   : >> { %v1157_v55 = vmul.f32 1.442695, %v1155_v54 }
 0x54f   : >> { %v1154_v56 = vpop.xlane.xlu1 %1153 }
 0x550   : >> { %2484 = vpow2.f32 %v1157_v55  ;;  %v1156_v57 = vsub.f32 %v1145_v37, %v1154_v56 }
 0x552   : >> { %v2481_v58 = vpop.eup %2480  ;;  %v1159_v59 = vmul.f32 1.442695, %v1156_v57 }
 0x553   : >> { %v1279_v60 = vpop.xlane.xlu0 %1278  ;;  %v1032_v61 = vsel %vm850_vm2, %v2481_v58, 0.0 }
 0x554   : >> { %v2483_v62 = vpop.eup %2482  ;;  %2486 = vpow2.f32 %v1159_v59  ;;  %v1283_v63 = vsub.f32 %v1270_v40, %v1279_v60  ;;  %1033 = vadd.xlane.f32.xlu0 %v1032_v61  ;;  %v2504_v61 = vld [vmem:[%s2821_s14] sm:$0xff] (%p838_p8)  }
 0x555   : >> { %v1035_v1 = vsel %vm850_vm2, %v2483_v62, 0.0  ;;  %v1282_v15 = vpop.xlane.xlu1 %1281  ;;  %2303 = vmatprep.subr.bf16.mxu1 (%p838_p8), %v2504_v61 }
 0x556   : >> { %v1285_v2 = vmul.f32 1.442695, %v1283_v63  ;;  %1036 = vadd.xlane.f32.xlu1 %v1035_v1  ;;  %v1284_v16 = vsub.f32 %v1273_v43, %v1282_v15  ;;  %2304 = vmatpush3.bf16.msra.mxu1 (%p838_p8), %v2504_v61  ;;  %v2506_v63 = vld [vmem:[%s2821_s14 + $0x10] sm:$0xff] (%p838_p8)  }
 0x558   : >> { %2488 = vpow2.f32 %v1285_v2  ;;  %v1287_v17 = vmul.f32 1.442695, %v1284_v16  ;;  %v2507_v2 = vld [vmem:[%s2821_s14 + $0x18] sm:$0xff] (%p838_p8)  }
 0x55a   : >> { %v2485_v3 = vpop.eup %2484  ;;  %2490 = vpow2.f32 %v1287_v17 }
 0x55b   : >> { %v1161_v4 = vsel %vm850_vm2, %v2485_v3, 0.0 }
 0x55c   : >> { %1162 = vadd.xlane.f32.xlu0 %v1161_v4  ;;  %v2164_v4 = vld [vmem:[%s3173_s28] ss:$0 sm:$0xff] (%p838_p8) }
 0x55e   : >> { %v2487_v5 = vpop.eup %2486 }
 0x55f   : >> { %v1164_v6 = vsel %vm850_vm2, %v2487_v5, 0.0 }
 0x560   : >> { %1165 = vadd.xlane.f32.xlu1 %v1164_v6 }
 0x562   : >> { %v2489_v7 = vpop.eup %2488 }
 0x563   : >> { %v1289_v14 = vsel %vm850_vm2, %v2489_v7, 0.0 }
 0x564   : >> { %1290 = vadd.xlane.f32.xlu0 %v1289_v14  ;;  %v2491_v18 = vpop.eup %2490 }
 0x565   : >> { %v1292_v19 = vsel %vm850_vm2, %v2491_v18, 0.0 }
 0x571   : >> { %1172 = vrot.lane.b32.xlu1 %v2909_v0, %s2620_s13  ;;  %s3175_s13 = scalar_lea.vmem (%p838_p8), %s3136_s5, %s2799_s20 }
 0x57a   : >> { %1044 = vrot.lane.b32.xlu0 %v2909_v0, %s2621_s1 }
 0x595   : >> { %1293 = vadd.xlane.f32.xlu1 %v1292_v19 }
 0x5a6   : >> { %1300 = vrot.lane.b32.xlu1 %v2909_v0, %s2624_s21 }
 0x5e1   : >> { %v1034_v21 = vpop.xlane.xlu0 %1033 }
 0x5e3   : >> { %v1037_v20 = vpop.xlane.xlu1 %1036 }
 0x5e4   : >> { %2492 = vrcp.f32 %v1037_v20 }
 0x5e5   : >> { %2494 = vrcp.f32 %v1034_v21 }
 0x5e9   : >> { %v1163_v22 = vpop.xlane.xlu0 %1162 }
 0x5ed   : >> { %v1166_v23 = vpop.xlane.xlu1 %1165 }
 0x5ee   : >> { %2496 = vrcp.f32 %v1166_v23  ;;  %v2493_v24 = vpop.eup %2492 }
 0x5ef   : >> { %2498 = vrcp.f32 %v1163_v22  ;;  %v2495_v26 = vpop.eup %2494  ;;  %v1041_v27 = vmul.f32 %v2493_v24, %v2483_v62  ;;  %v2505_v62 = vld [vmem:[%s2821_s14 + $0x8] sm:$0xff] (%p838_p8)   ;;  %s3174_s14 = sld [smem:[#allocation15_spill]] (%p838_p8) }
 0x5f0   : >> { %v1040_v28 = vmul.f32 %v2495_v26, %v2481_v58  ;;  %2305 = vmatprep.subr.bf16.mxu1 (%p838_p8), %v2505_v62 }
 0x5f1   : >> { %v1291_v25 = vpop.xlane.xlu0 %1290  ;;  %v1173_v0 = vpop.permute.xlu1 %1172  ;;  %2306 = vmatpush3.bf16.msra.mxu1 (%p838_p8), %v2505_v62 }
 0x5f2   : >> { %v1042_v30 = vpack.c.bf16 %v1041_v27, %v1040_v28  ;;  %2500 = vrcp.f32 %v1291_v25  ;;  %2307 = vmatprep.subr.bf16.mxu1 (%p838_p8), %v2506_v63 }
 0x5f5   : >> { %v1045_v29 = vpop.permute.xlu0 %1044  ;;  %2308 = vmatpush3.bf16.msra.mxu1 (%p838_p8), %v2506_v63 }
 0x5f6   : >> { %2274 = vmatpush3.bf16.msra.mxu0 %v1045_v29  ;;  %2309 = vmatprep.subr.bf16.mxu1 (%p838_p8), %v2507_v2 }
 0x5f7   : >> { %2285 = vmatprep.subr.bf16.mxu0 %v2616_v44 }
 0x5f8   : >> { %v2497_v31 = vpop.eup %2496 }
 0x5f9   : >> { %2276 = vmatmul.mubr.msk.bf16.vlgmr.msra.gmra.mrb[4].mxu0 %vm850_vm2, %v1042_v30  ;;  %v2499_v32 = vpop.eup %2498  ;;  %v1170_v33 = vmul.f32 %v2497_v31, %v2487_v5  ;;  %2310 = vmatpush3.bf16.msra.mxu1 (%p838_p8), %v2507_v2 }
 0x5fa   : >> { %2286 = vmatpush3.bf16.msra.mxu0 %v1173_v0  ;;  %2287 = vmatprep.mubr.msk.bf16.mxu0 %vm2617_vm1, %v2616_v44  ;;  %v1169_v34 = vmul.f32 %v2499_v32, %v2485_v3 }
 0x5fb   : >> { %2297 = vmatprep.subr.bf16.mxu0 %v2616_v44 }
 0x5fc   : >> { %v1171_v35 = vpack.c.bf16 %v1170_v33, %v1169_v34  ;;  %v2501_v38 = vpop.eup %2500 }
 0x5fd   : >> { %v1297_v40 = vmul.f32 %v2501_v38, %v2489_v7 }
 0x601   : >> { %2288 = vmatmul.mubr.msk.bf16.vlgmr.msra.gmra.mrb[8].mxu0 %vm850_vm2, %v1171_v35 }
 0x602   : >> { %2299 = vmatprep.mubr.msk.bf16.mxu0 %vm2617_vm1, %v2616_v44 }
 0x622   : >> { %v1294_v36 = vpop.xlane.xlu1 %1293 }
 0x623   : >> { %2502 = vrcp.f32 %v1294_v36 }
 0x626   : >> { %v1301_v37 = vpop.permute.xlu1 %1300 }
 0x627   : >> { %2298 = vmatpush3.bf16.msra.mxu0 %v1301_v37 }
 0x62d   : >> { %v2503_v39 = vpop.eup %2502 }
 0x62e   : >> { %v1298_v41 = vmul.f32 %v2503_v39, %v2491_v18 }
 0x630   : >> { %v1299_v42 = vpack.c.bf16 %v1298_v41, %v1297_v40  ;;  %v2508_v40 = vld [vmem:[%s3174_s14] sm:$0xff] (%p838_p8)   ;;  %v2509_v41 = vld [vmem:[%s3174_s14 + $0x8] sm:$0xff] (%p838_p8)  }
 0x631   : > { %2315 = vmatprep.subr.bf16.mxu1 (%p838_p8), %v2508_v40 }
 0x632   : >> { %2300 = vmatmul.mubr.msk.bf16.vlgmr.msra.gmra.mrb[12].mxu0 %vm850_vm2, %v1299_v42  ;;  %v2510_v42 = vld [vmem:[%s3174_s14 + $0x10] sm:$0xff] (%p838_p8)  }
 0x6cc   : >> { %v1084_v43 = vpop.f32.mrb[4].mxu0 }
 0x6cd   : >> { %v2277_v45 = vpop.f32.mrb[5].mxu0 }
 0x6ce   : >> { %v1087_v46 = vpop.f32.mrb[6].mxu0  ;;  %v2512_v45 = vld [vmem:[%s2838_s29] sm:$0xff] (%p838_p8)  }
 0x6cf   : >> { %v1091_v47 = vpack.c.bf16 %v1087_v46, %v1084_v43  ;;  %v2278_v48 = vpop.f32.mrb[7].mxu0  ;;  %v2511_v43 = vld [vmem:[%s3174_s14 + $0x18] sm:$0xff] (%p838_p8)   ;;  %v2513_v46 = vld [vmem:[%s2838_s29 + $0x8] sm:$0xff] (%p838_p8)   ;;  %2327 = vmatprep.subr.bf16.mxu0 (%p838_p8), %v2512_v45 }
 0x6d0   : > { %2328 = vmatpush3.bf16.msra.mxu0 (%p838_p8), %v2512_v45  ;;  %v2515_v48 = vld [vmem:[%s2838_s29 + $0x18] sm:$0xff] (%p838_p8)  }
 0x6d1   : >> { %1093 = vrot.lane.b32.xlu0 %v1091_v47, %s2623_s16  ;;  %2329 = vmatprep.subr.bf16.mxu0 (%p838_p8), %v2513_v46  ;;  %v2514_v47 = vld [vmem:[%s2838_s29 + $0x10] sm:$0xff] (%p838_p8)  }
 0x6d4   : >> { %v1212_v44 = vpop.f32.mrb[8].mxu0  ;;  %2330 = vmatpush3.bf16.msra.mxu0 (%p838_p8), %v2513_v46 }
 0x6d5   : >> { %v2289_v49 = vpop.f32.mrb[9].mxu0  ;;  %2331 = vmatprep.subr.bf16.mxu0 (%p838_p8), %v2514_v47 }
 0x6d6   : >> { %v1215_v50 = vpop.f32.mrb[10].mxu0  ;;  %v2517_v49 = vld [vmem:[%s2838_s29 + $0x28] sm:$0xff] (%p838_p8)  }
 0x6d7   : >> { %v1219_v51 = vpack.c.bf16 %v1215_v50, %v1212_v44  ;;  %v2290_v52 = vpop.f32.mrb[11].mxu0  ;;  %v2516_v44 = vld [vmem:[%s2838_s29 + $0x20] sm:$0xff] (%p838_p8)  }
 0x6d8   : > { %2332 = vmatpush3.bf16.msra.mxu0 (%p838_p8), %v2514_v47 }
 0x6d9   : >> { %1221 = vrot.lane.b32.xlu1 %v1219_v51, %s2622_s26  ;;  %2333 = vmatprep.subr.bf16.mxu0 (%p838_p8), %v2515_v48 }
 0x6dc   : > { %2334 = vmatpush3.bf16.msra.mxu0 (%p838_p8), %v2515_v48 }
 0x6dd   : > { %2335 = vmatprep.subr.bf16.mxu0 (%p838_p8), %v2516_v44 }
 0x6e0   : > { %2336 = vmatpush3.bf16.msra.mxu0 (%p838_p8), %v2516_v44 }
 0x6e1   : > { %2337 = vmatprep.subr.bf16.mxu0 (%p838_p8), %v2517_v49 }
 0x6e4   : > { %2338 = vmatpush3.bf16.msra.mxu0 (%p838_p8), %v2517_v49 }
 0x705   : >> { %v1340_v53 = vpop.f32.mrb[12].mxu0 }
 0x706   : >> { %v2301_v54 = vpop.f32.mrb[13].mxu0 }
 0x707   : >> { %v1343_v55 = vpop.f32.mrb[14].mxu0 }
 0x708   : >> { %v1347_v56 = vpack.c.bf16 %v1343_v55, %v1340_v53  ;;  %v2302_v57 = vpop.f32.mrb[15].mxu0 }
 0x70a   : >> { %1349 = vrot.lane.b32.xlu0 %v1347_v56, %s2619_s19 }
 0x743   : >> { %v1094_v58 = vpop.permute.xlu0 %1093 }
 0x744   : >> { %1097 = vst.msk [vmem:[%s2933_s7] sm:$0xff] %vm1096_vm3, %v1094_v58 }
 0x74b   : >> { %v1222_v59 = vpop.permute.xlu1 %1221 }
 0x74c   : >> { %1225 = vst.msk [vmem:[%s2933_s7] sm:$0xff] %vm1224_vm4, %v1222_v59 }
 0x777   : > { %840 = sbr.rel (!%p838_p8) target bundleno = 323 (0x143), region = 204 }
 0x77c   : >> { %v1350_v60 = vpop.permute.xlu0 %1349 }
 0x77d   : >> { %1353 = vst.msk [vmem:[%s2933_s7] sm:$0xff] %vm1352_vm5, %v1350_v60 }
 0x77e   : > { %s3177_s17 = sld [smem:[#allocation21_spill]] (!%p2191_p4)  ;;  %vm1949_vm6 = vcmask (!%p2191_p4), 31744  }
 0x784   : > { %v1354_v1 = vld [vmem:[#allocation4] sm:$0xff]  ;;  %v1355_v3 = vld [vmem:[#allocation4 + $0x8] sm:$0xff] }
 0x785   : > { %2311 = vmatprep.mubr.msk.bf16.mxu1 %vm768_vm0, %v1354_v1  ;;  %v2171_v1 = vld [vmem:[%s3175_s13] ss:$0 sm:$0xff] }
 0x786   : > { %2312 = vmatmul.mubr.msk.bf16.vlgmr.msra.gmra.mrb[0].mxu1 %vm768_vm0, %v1355_v3 }
 0x787   : > { %2316 = vmatpush3.bf16.msra.mxu1 %v2508_v40 }
 0x788   : > { %2317 = vmatprep.subr.bf16.mxu1 %v2509_v41 }
 0x78b   : > { %2318 = vmatpush3.bf16.msra.mxu1 %v2509_v41 }
 0x78c   : > { %2319 = vmatprep.subr.bf16.mxu1 %v2510_v42 }
 0x78f   : > { %2320 = vmatpush3.bf16.msra.mxu1 %v2510_v42 }
 0x790   : > { %2321 = vmatprep.subr.bf16.mxu1 %v2511_v43 }
 0x793   : > { %2322 = vmatpush3.bf16.msra.mxu1 %v2511_v43 }
 0x859   : > { %v2313_v5 = vpop.f32.mrb[0].mxu1 }
 0x85a   : > { %v1444_v6 = vadd.f32 %v2313_v5, %v2164_v4  ;;  %v1435_v7 = vpop.f32.mrb[1].mxu1 }
 0x85b   : > { %v1436_v14 = vadd.f32 %v2164_v4, %v1435_v7  ;;  %v2314_v15 = vpop.f32.mrb[2].mxu1  ;;  %v2172_v7 = vld [vmem:[%s631_s23] ss:$0 sm:$0xff] }
 0x85c   : > { %v1452_v16 = vadd.f32 %v1444_v6, %v706_v12  ;;  %v1447_v17 = vadd.f32 %v2314_v15, %v2164_v4  ;;  %v1438_v18 = vpop.f32.mrb[3].mxu1 }
 0x85d   : > { %v1450_v19 = vadd.f32 %v1436_v14, %v704_v10  ;;  %v1439_v20 = vadd.f32 %v2164_v4, %v1438_v18 }
 0x85e   : > { %v1453_v21 = vadd.f32 %v1447_v17, %v707_v13  ;;  %v1462_v22 = vsel %vm768_vm0, %v1452_v16, 0.0 }
 0x85f   : > { %v1451_v23 = vadd.f32 %v1439_v20, %v705_v11  ;;  %1463 = vadd.xlane.f32.xlu1 %v1462_v22  ;;  %v1456_v24 = vsel %vm768_vm0, %v1450_v19, 0.0 }
 0x860   : > { %1457 = vadd.xlane.f32.xlu0 %v1456_v24  ;;  %v1465_v12 = vsel %vm768_vm0, %v1453_v21, 0.0 }
 0x861   : > { %v1459_v25 = vsel %vm768_vm0, %v1451_v23, 0.0 }
 0x863   : > { %1466 = vadd.xlane.f32.xlu1 %v1465_v12  ;;  %v2518_v12 = vld [vmem:[%s2838_s29 + $0x30] sm:$0xff]  }
 0x864   : > { %1460 = vadd.xlane.f32.xlu0 %v1459_v25  ;;  %2339 = vmatprep.subr.bf16.mxu0 %v2518_v12  ;;  %v2519_v25 = vld [vmem:[%s2838_s29 + $0x38] sm:$0xff]  }
 0x865   : > { %2340 = vmatpush3.bf16.msra.mxu0 %v2518_v12 }
 0x866   : > { %2341 = vmatprep.subr.bf16.mxu0 %v2519_v25 }
 0x869   : > { %2342 = vmatpush3.bf16.msra.mxu0 %v2519_v25 }
 0x8ec   : > { %v1464_v10 = vpop.xlane.xlu1 %1463 }
 0x8ed   : > { %v1471_v26 = vmul.f32 0.015625, %v1464_v10  ;;  %v1458_v27 = vpop.xlane.xlu0 %1457  ;;  %v2173_v10 = vld [vmem:[%s634_s2] ss:$0 sm:$0xff] }
 0x8ee   : > { %v1469_v9 = vmul.f32 0.015625, %v1458_v27 }
 0x8ef   : > { %v2996_v13 = vsub.f32 %v1452_v16, %v1471_v26 }
 0x8f0   : > { %v2998_v28 = vsub.f32 %v1450_v19, %v1469_v9  ;;  %v1467_v8 = vpop.xlane.xlu1 %1466 }
 0x8f1   : > { %v1472_v11 = vmul.f32 0.015625, %v1467_v8  ;;  %v1461_v29 = vpop.xlane.xlu0 %1460  ;;  %v1479_v34 = vmul.f32 %v2996_v13, %v2996_v13 }
 0x8f2   : > { %v1470_v30 = vmul.f32 0.015625, %v1461_v29  ;;  %v1477_v31 = vmul.f32 %v2998_v28, %v2998_v28 }
 0x8f3   : > { %v3002_v0 = vsub.f32 %v1453_v21, %v1472_v11  ;;  %v1487_v36 = vsel %vm768_vm0, %v1479_v34, 0.0 }
 0x8f4   : > { %v3004_v32 = vsub.f32 %v1451_v23, %v1470_v30  ;;  %v1481_v33 = vsel %vm768_vm0, %v1477_v31, 0.0 }
 0x8f5   : > { %1482 = vadd.xlane.f32.xlu0 %v1481_v33  ;;  %v1480_v38 = vmul.f32 %v3002_v0, %v3002_v0 }
 0x8f6   : > { %v1478_v35 = vmul.f32 %v3004_v32, %v3004_v32 }
 0x8f7   : > { %v1490_v39 = vsel %vm768_vm0, %v1480_v38, 0.0 }
 0x8f8   : > { %v1484_v37 = vsel %vm768_vm0, %v1478_v35, 0.0  ;;  %v2180_v35 = vld [vmem:[%s642_s18] ss:$0 sm:$0xff] }
 0x8f9   : > { %1488 = vadd.xlane.f32.xlu0 %v1487_v36  ;;  %1485 = vadd.xlane.f32.xlu1 %v1484_v37 }
 0x8fd   : > { %1491 = vadd.xlane.f32.xlu1 %v1490_v39 }
 0x982   : > { %v1483_v50 = vpop.xlane.xlu0 %1482 }
 0x983   : > { %v1493_v51 = vmul.f32 0.015625, %v1483_v50 }
 0x985   : > { %v1497_v52 = vadd.f32 1e-05, %v1493_v51 }
 0x986   : > { %v1486_v53 = vpop.xlane.xlu1 %1485  ;;  %v1489_v54 = vpop.xlane.xlu0 %1488 }
 0x987   : > { %2520 = vrsqrt.f32 %v1497_v52  ;;  %v1494_v55 = vmul.f32 0.015625, %v1486_v53  ;;  %v1495_v56 = vmul.f32 0.015625, %v1489_v54 }
 0x989   : > { %v1498_v57 = vadd.f32 1e-05, %v1494_v55  ;;  %v1499_v58 = vadd.f32 1e-05, %v1495_v56 }
 0x98a   : > { %v1492_v59 = vpop.xlane.xlu1 %1491 }
 0x98b   : > { %2522 = vrsqrt.f32 %v1498_v57  ;;  %v1496_v60 = vmul.f32 0.015625, %v1492_v59 }
 0x98c   : > { %2524 = vrsqrt.f32 %v1499_v58 }
 0x98d   : > { %v1500_v61 = vadd.f32 1e-05, %v1496_v60 }
 0x98f   : > { %2526 = vrsqrt.f32 %v1500_v61 }
 0x991   : > { %v2521_v62 = vpop.eup %2520 }
 0x992   : > { %v1505_v63 = vmul.f32 %v2521_v62, %v2998_v28 }
 0x994   : > { %v1515_v5 = vmul.f32 %v2171_v1, %v1505_v63 }
 0x995   : > { %v2523_v2 = vpop.eup %2522 }
 0x996   : > { %v2525_v3 = vpop.eup %2524  ;;  %v1506_v4 = vmul.f32 %v2523_v2, %v3004_v32  ;;  %v1525_v17 = vadd.f32 %v2172_v7, %v1515_v5 }
 0x997   : > { %v1507_v6 = vmul.f32 %v2525_v3, %v2996_v13 }
 0x998   : > { %v1516_v14 = vmul.f32 %v2171_v1, %v1506_v4 }
 0x999   : > { %v2527_v15 = vpop.eup %2526  ;;  %v1517_v19 = vmul.f32 %v2171_v1, %v1507_v6 }
 0x99a   : > { %v1508_v16 = vmul.f32 %v2527_v15, %v3002_v0  ;;  %v1526_v18 = vadd.f32 %v2172_v7, %v1516_v14 }
 0x99b   : > { %v1527_v22 = vadd.f32 %v2172_v7, %v1517_v19 }
 0x99c   : > { %v1529_v20 = vpack.c.bf16 %v1526_v18, %v1525_v17  ;;  %v1518_v21 = vmul.f32 %v2171_v1, %v1508_v16 }
 0x99e   : > { %2323 = vmatprep.mubr.msk.bf16.mxu1 %vm768_vm0, %v1529_v20  ;;  %v1528_v23 = vadd.f32 %v2172_v7, %v1518_v21 }
 0x9a0   : > { %v1530_v24 = vpack.c.bf16 %v1528_v23, %v1527_v22 }
 0x9a2   : > { %2324 = vmatmul.mubr.msk.bf16.vlgmr.msra.gmra.mrb[4].mxu1 %vm768_vm0, %v1530_v24 }
 0xa75   : > { %v2325_v26 = vpop.f32.mrb[4].mxu1 }
 0xa76   : > { %v1619_v27 = vadd.f32 %v2325_v26, %v2173_v10  ;;  %v1610_v9 = vpop.f32.mrb[5].mxu1  ;;  %v2189_v26 = vld [vmem:[%s645_s30] ss:$0 sm:$0xff]  ;;  %s3178_s30 = sld [smem:[#allocation22_spill]] (!%p2191_p4) }
 0xa77   : > { %v1611_v13 = vadd.f32 %v2173_v10, %v1610_v9  ;;  %v2326_v28 = vpop.f32.mrb[6].mxu1 }
 0xa78   : > { %v1622_v8 = vadd.f32 %v2326_v28, %v2173_v10  ;;  %v1613_v11 = vpop.f32.mrb[7].mxu1  ;;  %v1627_v30 = vmax.f32 %v1619_v27, 0.0 }
 0xa79   : > { %v1614_v29 = vadd.f32 %v2173_v10, %v1613_v11  ;;  %v1625_v0 = vmax.f32 %v1611_v13, 0.0  ;;  %v2190_v11 = vld [vmem:[%s648_s27] ss:$0 sm:$0xff]  ;;  %s3176_s27 = sld [smem:[#allocation20_spill]] (!%p2191_p4) }
 0xa7a   : > { %v1628_v31 = vmax.f32 %v1622_v8, 0.0 }
 0xa7b   : > { %v1626_v32 = vmax.f32 %v1614_v29, 0.0 }
 0xa7c   : > { %v1630_v33 = vpack.c.bf16 %v1628_v31, %v1627_v30 }
 0xa7d   : > { %v1629_v34 = vpack.c.bf16 %v1626_v32, %v1625_v0 }
 0xa7f   : > { %2343 = vmatprep.mubr.bf16.mxu0 %v1629_v34 }
 0xa80   : > { %2344 = vmatmul.mubr.bf16.vlgmr.msra.gmra.mrb[0].mxu0 %v1630_v33 }
 0xb53   : > { %v2345_v36 = vpop.f32.mrb[0].mxu0 }
 0xb54   : > { %v1736_v37 = vpop.f32.mrb[1].mxu0  ;;  %v1745_v38 = vadd.f32 %v2345_v36, %v2180_v35 }
 0xb55   : > { %v1737_v39 = vadd.f32 %v2180_v35, %v1736_v37  ;;  %v2346_v40 = vpop.f32.mrb[2].mxu0 }
 0xb56   : > { %v1739_v41 = vpop.f32.mrb[3].mxu0  ;;  %v1748_v42 = vadd.f32 %v2346_v40, %v2180_v35  ;;  %v1753_v48 = vadd.f32 %v1745_v38, %v1527_v22  ;;  %v1837_v40 = vld [vmem:[%s3176_s27] sm:$0xff] (!%p2191_p4) }
 0xb57   : > { %v1740_v43 = vadd.f32 %v2180_v35, %v1739_v41  ;;  %v1751_v45 = vadd.f32 %v1737_v39, %v1525_v17  ;;  %v1838_v41 = vld [vmem:[%s3176_s27 + $0x8] sm:$0xff] (!%p2191_p4) }
 0xb58   : > { %v1754_v49 = vadd.f32 %v1748_v42, %v1528_v23  ;;  %v1763_v50 = vsel %vm768_vm0, %v1753_v48, 0.0  ;;  %v1839_v42 = vld [vmem:[%s3176_s27 + $0x10] sm:$0xff] (!%p2191_p4) }
 0xb59   : > { %v1757_v46 = vsel %vm768_vm0, %v1751_v45, 0.0  ;;  %v1752_v47 = vadd.f32 %v1740_v43, %v1526_v18  ;;  %v2369_v43 = vpack.c.bf16 (!%p2191_p4), %v1838_v41, %v1837_v40 }
 0xb5a   : > { %1758 = vadd.xlane.f32.xlu0 %v1757_v46  ;;  %v1766_v51 = vsel %vm768_vm0, %v1754_v49, 0.0 }
 0xb5b   : > { %v1760_v44 = vsel %vm768_vm0, %v1752_v47, 0.0  ;;  %2370 = vmatprep.subr.bf16.mxu0 (!%p2191_p4), %v2369_v43  ;;  %2393 = vmatprep.subr.bf16.mxu1 (!%p2191_p4), %v2369_v43 }
 0xb5c   : > { %1761 = vadd.xlane.f32.xlu1 %v1760_v44  ;;  %2372 = vmatpush3.bf16.msra.mxu0 (!%p2191_p4), %v2369_v43 }
 0xb5d   : > { %2397 = vmatpush3.bf16.msra.mxu1 (!%p2191_p4), %v2369_v43 }
 0xb5e   : > { %1764 = vadd.xlane.f32.xlu0 %v1763_v50  ;;  %v1844_v50 = vld [vmem:[%s3176_s27 + $0x38] sm:$0xff] (!%p2191_p4) }
 0xb60   : > { %1767 = vadd.xlane.f32.xlu1 %v1766_v51 }
 0xbe7   : > { %v1759_v52 = vpop.xlane.xlu0 %1758 }
 0xbe8   : > { %v1769_v53 = vmul.f32 0.015625, %v1759_v52  ;;  %v2192_v52 = vld [vmem:[%s3177_s17] ss:$0 sm:$0xff] (!%p2191_p4) }
 0xbe9   : > { %v1762_v54 = vpop.xlane.xlu1 %1761 }
 0xbea   : > { %v1773_v55 = vsub.f32 %v1751_v45, %v1769_v53  ;;  %v1770_v56 = vmul.f32 0.015625, %v1762_v54  ;;  %v1840_v45 = vld [vmem:[%s3176_s27 + $0x18] sm:$0xff] (!%p2191_p4) }
 0xbeb   : > { %v1765_v57 = vpop.xlane.xlu0 %1764  ;;  %v2373_v46 = vpack.c.bf16 (!%p2191_p4), %v1840_v45, %v1839_v42 }
 0xbec   : > { %v1774_v58 = vsub.f32 %v1752_v47, %v1770_v56  ;;  %v1771_v59 = vmul.f32 0.015625, %v1765_v57  ;;  %v1777_v60 = vmul.f32 %v1773_v55, %v1773_v55  ;;  %v1841_v47 = vld [vmem:[%s3176_s27 + $0x20] sm:$0xff] (!%p2191_p4) }
 0xbed   : > { %v1768_v61 = vpop.xlane.xlu1 %1767  ;;  %2374 = vmatprep.subr.bf16.mxu0 (!%p2191_p4), %v2373_v46  ;;  %2394 = vmatprep.subr.bf16.mxu1 (!%p2191_p4), %v2373_v46 }
 0xbee   : > { %v1775_v62 = vsub.f32 %v1753_v48, %v1771_v59  ;;  %v1772_v63 = vmul.f32 0.015625, %v1768_v61  ;;  %v1781_v1 = vsel %vm768_vm0, %v1777_v60, 0.0  ;;  %v1778_v2 = vmul.f32 %v1774_v58, %v1774_v58  ;;  %v1842_v48 = vld [vmem:[%s3176_s27 + $0x28] sm:$0xff] (!%p2191_p4)  ;;  %2376 = vmatpush3.bf16.msra.mxu0 (!%p2191_p4), %v2373_v46  ;;  %2398 = vmatpush3.bf16.msra.mxu1 (!%p2191_p4), %v2373_v46 }
 0xbef   : > { %1782 = vadd.xlane.f32.xlu0 %v1781_v1  ;;  %v2377_v44 = vpack.c.bf16 (!%p2191_p4), %v1842_v48, %v1841_v47 }
 0xbf0   : > { %v1776_v3 = vsub.f32 %v1754_v49, %v1772_v63  ;;  %v1784_v4 = vsel %vm768_vm0, %v1778_v2, 0.0  ;;  %v1779_v5 = vmul.f32 %v1775_v62, %v1775_v62  ;;  %v1843_v49 = vld [vmem:[%s3176_s27 + $0x30] sm:$0xff] (!%p2191_p4) }
 0xbf1   : > { %1785 = vadd.xlane.f32.xlu1 %v1784_v4  ;;  %2378 = vmatprep.subr.bf16.mxu0 (!%p2191_p4), %v2377_v44  ;;  %v2381_v51 = vpack.c.bf16 (!%p2191_p4), %v1844_v50, %v1843_v49 }
 0xbf2   : > { %v1787_v6 = vsel %vm768_vm0, %v1779_v5, 0.0  ;;  %v1780_v7 = vmul.f32 %v1776_v3, %v1776_v3  ;;  %2395 = vmatprep.subr.bf16.mxu1 (!%p2191_p4), %v2377_v44  ;;  %2380 = vmatpush3.bf16.msra.mxu0 (!%p2191_p4), %v2377_v44 }
 0xbf3   : > { %1788 = vadd.xlane.f32.xlu0 %v1787_v6  ;;  %2399 = vmatpush3.bf16.msra.mxu1 (!%p2191_p4), %v2377_v44 }
 0xbf4   : > { %v1790_v14 = vsel %vm768_vm0, %v1780_v7, 0.0  ;;  %2382 = vmatprep.subr.bf16.mxu0 (!%p2191_p4), %v2381_v51  ;;  %2396 = vmatprep.subr.bf16.mxu1 (!%p2191_p4), %v2381_v51 }
 0xbf5   : > { %1791 = vadd.xlane.f32.xlu1 %v1790_v14 }
 0xbf6   : > { %2384 = vmatpush3.bf16.msra.mxu0 (!%p2191_p4), %v2381_v51 }
 0xbf7   : > { %2400 = vmatpush3.bf16.msra.mxu1 (!%p2191_p4), %v2381_v51 }
 0xc7c   : > { %v1783_v15 = vpop.xlane.xlu0 %1782 }
 0xc7d   : > { %v1793_v16 = vmul.f32 0.015625, %v1783_v15 }
 0xc7e   : > { %v1786_v17 = vpop.xlane.xlu1 %1785 }
 0xc7f   : > { %v1797_v18 = vadd.f32 1e-05, %v1793_v16  ;;  %v1794_v19 = vmul.f32 0.015625, %v1786_v17 }
 0xc80   : > { %v1789_v20 = vpop.xlane.xlu0 %1788 }
 0xc81   : > { %2528 = vrsqrt.f32 %v1797_v18  ;;  %v1798_v21 = vadd.f32 1e-05, %v1794_v19  ;;  %v1795_v22 = vmul.f32 0.015625, %v1789_v20 }
 0xc82   : > { %v1792_v23 = vpop.xlane.xlu1 %1791 }
 0xc83   : > { %2530 = vrsqrt.f32 %v1798_v21  ;;  %v1799_v24 = vadd.f32 1e-05, %v1795_v22  ;;  %v1796_v12 = vmul.f32 0.015625, %v1792_v23 }
 0xc85   : > { %2532 = vrsqrt.f32 %v1799_v24  ;;  %v1800_v25 = vadd.f32 1e-05, %v1796_v12 }
 0xc87   : > { %2534 = vrsqrt.f32 %v1800_v25 }
 0xc8b   : > { %v2529_v10 = vpop.eup %2528 }
 0xc8c   : > { %v1805_v27 = vmul.f32 %v2529_v10, %v1773_v55 }
 0xc8d   : > { %v2531_v9 = vpop.eup %2530 }
 0xc8e   : > { %v1815_v13 = vmul.f32 %v2189_v26, %v1805_v27  ;;  %v1806_v28 = vmul.f32 %v2531_v9, %v1774_v58 }
 0xc8f   : > { %v2533_v8 = vpop.eup %2532 }
 0xc90   : > { %v1816_v29 = vmul.f32 %v2189_v26, %v1806_v28  ;;  %v1807_v30 = vmul.f32 %v2533_v8, %v1775_v62  ;;  %v1825_v0 = vadd.f32 %v2190_v11, %v1815_v13 }
 0xc91   : > { %v2535_v31 = vpop.eup %2534 }
 0xc92   : > { %v1826_v32 = vadd.f32 %v2190_v11, %v1816_v29  ;;  %v1817_v33 = vmul.f32 %v2189_v26, %v1807_v30  ;;  %v1808_v34 = vmul.f32 %v2535_v31, %v1776_v3  ;;  %2363 = vmatprep.mubr.msk.f32.mxu0 (!%p2191_p4), %vm768_vm0, %v1825_v0 }
 0xc94   : > { %v1829_v35 = vpack.c.bf16 %v1826_v32, %v1825_v0  ;;  %v1818_v36 = vmul.f32 %v2189_v26, %v1808_v34  ;;  %v1827_v37 = vadd.f32 %v2190_v11, %v1817_v33  ;;  %1836 = sbr.rel (%p2191_p4) target bundleno = 3440 (0xd70), region = 129  ;;  %2364 = vmatmul.mubr.msk.f32.vlgmr.msra.gmra.mrb[0].mxu0 (!%p2191_p4), %vm768_vm0, %v1826_v32 }
 0xc96   : > { %1831 = vst.msk [vmem:[#allocation2] sm:$0xff] %vm768_vm0, %v1829_v35  ;;  %v1828_v38 = vadd.f32 %v2190_v11, %v1818_v36  ;;  %2366 = vmatprep.mubr.msk.f32.mxu1 (!%p2191_p4), %vm768_vm0, %v1827_v37 }
 0xc98   : > { %v1830_v39 = vpack.c.bf16 %v1828_v38, %v1827_v37  ;;  %2367 = vmatmul.mubr.msk.f32.vlgmr.msra.gmra.mrb[0].mxu1 (!%p2191_p4), %vm768_vm0, %v1828_v38 }
 0xc9a   : > { %1832 = vst.msk [vmem:[#allocation2 + $0x8] sm:$0xff] %vm768_vm0, %v1830_v39 }
 0xd67   : > { %v2365_v53 = vpop.f32.mrb[0].mxu0 }
 0xd68   : > { %v1936_v55 = vadd.f32 %v2365_v53, %v2192_v52  ;;  %v1930_v57 = vpop.f32.mrb[1].mxu0 }
 0xd69   : > { %v1931_v59 = vadd.f32 %v2192_v52, %v1930_v57 }
 0xd6a   : > { %1951 = vst.msk [vmem:[%s3178_s30 + $0x8] sm:$0xff] %vm1949_vm6, %v1936_v55 }
 0xd6b   : > { %v2368_v54 = vpop.f32.mrb[0].mxu1  ;;  %1950 = vst.msk [vmem:[%s3178_s30] sm:$0xff] %vm1949_vm6, %v1931_v59 }
 0xd6c   : > { %v1946_v56 = vadd.f32 %v2368_v54, %v2192_v52  ;;  %v1940_v58 = vpop.f32.mrb[1].mxu1 }
 0xd6d   : > { %v1941_v60 = vadd.f32 %v2192_v52, %v1940_v58 }
 0xd6e   : > { %1953 = vst.msk [vmem:[%s3178_s30 + $0x18] sm:$0xff] %vm1949_vm6, %v1946_v56 }
 0xd6f   : > { %1952 = vst.msk [vmem:[%s3178_s30 + $0x10] sm:$0xff] %vm1949_vm6, %v1941_v60 }
 0xd70 PF: > { %s3179_s21 = sld [smem:[#allocation13_spill]]  ;;  %s3180_s18 = sld [smem:[#allocation11_spill]] }
 0xd71   : > { %s3181_s19 = sld [smem:[#allocation12_spill]]  ;;  %s3182_s20 = sld [smem:[#allocation14_spill]] }
 0xd76   : > { %p25_p5 = scmp.ge.s32.totalorder %s3179_s21, 4  }
 0xd78   :  { %27 = sbr.rel (!%p25_p5) target bundleno = 10 (0xa), region = 215 }
 0xd7f   :  { %1965 = vsyncpa [#allocation7], 1 }
 0xd80   :  { %1967 = vsyncpa [#allocation7 + $0x1], 1 }
 0xd81   :  { %1968 = vsyncmov [#allocation5] }
 0xd84   :  { %s1969_s13 = vpop.sfrf %1968 }
 0xd85   :  { %p2199_p6 = scmp.ne.s32.totalorder %s1969_s13, 0 }
 0xd87   :  { %1973 = shalt.err (%p2199_p6)  }

</bundles_post_ra>
